<compile_context>
chip_gen: v5e
topology: v5e:2x2
jax: 0.10.0
libtpu: 0.0.40
codegen_flags: <defaults>
</compile_context>

<pallas_src>
import jax
import jax.numpy as jnp
from jax.experimental import pallas as pl
from jax.experimental.pallas import tpu as pltpu


def _round_up(n: int, m: int) -> int:
    return ((n + m - 1) // m) * m


def _cdiv(n: int, m: int) -> int:
    return (n + m - 1) // m


# ----------------------------------------------------------------------------
# Pallas kernel: lane-packed symbolic expansion, block-diagonal MXU reduce,
# bias + sigmoid.
# ----------------------------------------------------------------------------
def _symbolic_cell_kernel(xp_ref, w_ref, b_ref, out_ref):
    # xp_ref : (TP, DP)   VMEM  packed x tile (P samples per DP = P*D lane row)
    # w_ref  : (3, DP, P) VMEM  block-diag weights [identity|square|sin], resident
    # b_ref  : (1,)       SMEM  bias scalar
    # out_ref: (TP, P)    VMEM  sigmoid(P) for the P samples of each packed row
    xp = xp_ref[...]

    # Weighted, per-sample segmented reduce on the (otherwise idle) MXU:
    # wblk[f, g*D+d, p] = w_f[d] * (g == p), so xp @ wblk[f] is exactly the
    # weighted reduce of symbolic feature f for each packed sample.  This
    # removes the VPU weight-multiplies and the XLU cross-lane reduce; the
    # remaining vector work is x*x and the sin polynomial.
    logits = jnp.dot(xp, w_ref[0], preferred_element_type=jnp.float32)
    logits = logits + jnp.dot(xp * xp, w_ref[1], preferred_element_type=jnp.float32)
    logits = logits + jnp.dot(jnp.sin(xp), w_ref[2], preferred_element_type=jnp.float32)

    out_ref[...] = jax.nn.sigmoid(logits + b_ref[0])


def symbolic_cell(x, weight, bias, *, target_tile_bytes: int = 4 << 20):
    """SYMBOLICCell forward.

    x: (B, D) f32, weight: (1, 3*D) f32 (nn.Linear layout), bias: (1,) f32.
    Returns sigmoid(Linear(concat([x, x*x, sin(x)], axis=1))): (B, 1) f32.
    """
    x = jnp.asarray(x, jnp.float32)
    weight = jnp.asarray(weight, jnp.float32)
    bias = jnp.asarray(bias, jnp.float32).reshape(1)
    B, D = x.shape
    assert weight.shape == (1, 3 * D), weight.shape

    # ---- Lane packing: P samples per packed row (free row-major reshape). ----
    max_p = max(1, 128 // D) if D <= 128 else 1
    P = 1
    for p in range(min(max_p, B), 0, -1):
        if B % p == 0:
            P = p
            break
    DP = P * D
    n_rows = B // P
    xp = x.reshape(n_rows, DP)          # free view; no jnp.pad / extra HBM pass

    # ---- Fold the Linear weights into block-diagonal MXU matrices. ----------
    w3 = weight.reshape(3, D)           # chunk order: [identity | square | sin]
    eye_p = jnp.eye(P, dtype=jnp.float32)
    wblk = (w3[:, None, :, None] * eye_p[None, :, None, :]).reshape(3, DP, P)

    # ---- Tile sizing: bytes-based, VMEM-budgeted, 2-TensorCore aware. -------
    try:
        vmem_cap = int(pltpu.get_tpu_info().vmem_capacity_bytes)
    except Exception:
        vmem_cap = 64 << 20                               # v7x physical (worst case)
    out_lanes = _round_up(P, 128)                         # VMEM lane padding of out
    w_vmem = 2 * 3 * _round_up(DP, 8) * 128 * 4           # resident weight block
    row_cost = 2 * DP * 4 + 2 * out_lanes * 4             # x + out, double-buffered
    vmem_budget = min(vmem_cap // 2, 28 << 20)            # stay well under v7x 64 MiB
    tp_cap = max(8, (vmem_budget - w_vmem - (2 << 20)) // row_cost)
    tp = max(8, min(target_tile_bytes // (DP * 4), tp_cap))  # ~4 MiB packed-x tile
    tp = _round_up(min(tp, _round_up(n_rows, 8)), 8)
    num_tiles = _cdiv(n_rows, tp)
    # v7x has 2 TensorCores: prefer >= 2 (and even, when cheap) tile counts so
    # the "parallel" batch axis keeps both busy; harmless on v5e/v6e (1 TC).
    if n_rows > 8:
        if num_tiles == 1:
            tp = _round_up(_cdiv(n_rows, 2), 8)
        elif num_tiles % 2 == 1 and num_tiles <= 8:
            tp = _round_up(_cdiv(n_rows, num_tiles + 1), 8)
        num_tiles = _cdiv(n_rows, tp)

    vmem_needed = row_cost * tp + w_vmem + (2 << 20)
    vmem_limit = min(max(vmem_needed + (4 << 20), 32 << 20),
                     max(vmem_cap - (8 << 20), 32 << 20))

    out = pl.pallas_call(
        _symbolic_cell_kernel,
        out_shape=jax.ShapeDtypeStruct((n_rows, P), jnp.float32),
        grid=(num_tiles,),
        in_specs=[
            pl.BlockSpec((tp, DP), lambda i: (i, 0)),            # packed x tile
            pl.BlockSpec((3, DP, P), lambda i: (0, 0, 0)),       # weights (resident)
            pl.BlockSpec(memory_space=pltpu.MemorySpace.SMEM),   # bias scalar
        ],
        # Output rows span the full last dim (P), so each tile's HBM writeback
        # is one contiguous chunk; output bytes are only 1/D of the input
        # stream, so lane density matters far less than for the x tiles.
        out_specs=pl.BlockSpec((tp, P), lambda i: (i, 0)),
        compiler_params=pltpu.CompilerParams(
            dimension_semantics=("parallel",),
            vmem_limit_bytes=int(vmem_limit),
        ),
        cost_estimate=pl.CostEstimate(
            flops=6 * B * D * P + 2 * B * D,
            transcendentals=B * D + B,                           # sin + sigmoid
            bytes_accessed=4 * (B * D + 3 * DP * P + 1 + B),
        ),
    )(xp, wblk, bias)

    return out.reshape(B, 1)


# ----------------------------------------------------------------------------
# Pure-JAX reference (mirrors the PyTorch forward exactly: concat + Linear)
# ----------------------------------------------------------------------------
def symbolic_cell_ref(x, weight, bias):
    functions = [
        lambda t: t,        # identity
        lambda t: t * t,    # square
        jnp.sin,            # sin
        jnp.cos,            # cos (masked out by f_code)
    ]
    f_code = [1, 1, 1, 0]
    sym = [functions[j](x) for j in range(len(functions)) if f_code[j]]
    sym_input = jnp.concatenate(sym, axis=1)                     # (B, 3D)
    logits = jnp.dot(sym_input, weight.T,
                     precision=jax.lax.Precision.HIGHEST) + bias  # (B, 1)
    return jax.nn.sigmoid(logits)


if __name__ == "__main__":
    # B=300, D=32: packs to (75, 128) rows, 2 batch tiles of 40 rows with a
    # ragged final tile (no host-side padding) — exercises the packed + ragged
    # + multi-tile path.
    B, D = 300, 32
    IN_FEATURES = 3 * D        # all_functions[0][1]

    key = jax.random.PRNGKey(0)
    kx, kw, kb = jax.random.split(key, 3)

    x = jax.random.normal(kx, (B, D), dtype=jnp.float32)

    # Deterministic init matching nn.Linear(IN_FEATURES, 1, bias=True):
    # uniform(-1/sqrt(in), 1/sqrt(in)) for both weight and bias.
    bound = float(IN_FEATURES) ** -0.5
    weight = jax.random.uniform(kw, (1, IN_FEATURES), jnp.float32, -bound, bound)
    bias = jax.random.uniform(kb, (1,), jnp.float32, -bound, bound)

    out = jax.block_until_ready(symbolic_cell(x, weight, bias))
    ref = jax.block_until_ready(symbolic_cell_ref(x, weight, bias))

    assert out.shape == (B, 1), out.shape
    err = float(jnp.max(jnp.abs(out - ref)))
    # MXU f32 matmul (multi-pass) vs exact-f32 reference: error is ~1e-6 level.
    assert err < 1e-4, f"max abs err {err}"
    print("KERNEL_OK")
</pallas_src>

<mosaic_0001>
module attributes {stable_mosaic.version = 11 : i64} {
  func.func @_symbolic_cell_kernel(%arg0: i32, %arg1: memref<40x128xf32, #tpu.memory_space<vmem>>, %arg2: memref<3x128x4xf32, #tpu.memory_space<vmem>>, %arg3: memref<1xf32, #tpu.memory_space<smem>>, %arg4: memref<40x4xf32, #tpu.memory_space<vmem>>) attributes {dimension_semantics = [#tpu.dimension_semantics<parallel>], iteration_bounds = array<i64: 2>, scalar_prefetch = 0 : i64, scratch_operands = 0 : i64, tpu.core_type = #tpu.core_type<tc>, window_params = [{transform_indices = @transform_0, window_bounds = array<i64: 40, 128>}, {pipeline_mode = #tpu.pipeline_mode<synchronous>, transform_indices = @transform_1, window_bounds = array<i64: 3, 128, 4>}, {transform_indices = @transform_2, window_bounds = array<i64: 1>}, {transform_indices = @transform_3, window_bounds = array<i64: 40, 4>}]} {
    %c0 = arith.constant 0 : index
    %c0_0 = arith.constant 0 : index
    %0 = vector.load %arg1[%c0, %c0_0] : memref<40x128xf32, #tpu.memory_space<vmem>>, vector<40x128xf32>
    %c0_1 = arith.constant 0 : index
    %c0_2 = arith.constant 0 : index
    %c0_3 = arith.constant 0 : index
    %1 = vector.load %arg2[%c0_1, %c0_2, %c0_3] : memref<3x128x4xf32, #tpu.memory_space<vmem>>, vector<1x128x4xf32>
    %2 = vector.shape_cast %1 : vector<1x128x4xf32> to vector<128x4xf32>
    %cst = arith.constant dense<0.000000e+00> : vector<40x4xf32>
    %3 = tpu.matmul %0, %2, %cst {dimension_numbers = #tpu.dot_dimension_numbers<[1], [0], [0], [1], [0, 0, 1, 1], [], []>} : vector<40x128xf32>, vector<128x4xf32>, vector<40x4xf32> -> vector<40x4xf32>
    %4 = arith.mulf %0, %0 : vector<40x128xf32>
    %c1 = arith.constant 1 : index
    %c0_4 = arith.constant 0 : index
    %c0_5 = arith.constant 0 : index
    %5 = vector.load %arg2[%c1, %c0_4, %c0_5] : memref<3x128x4xf32, #tpu.memory_space<vmem>>, vector<1x128x4xf32>
    %6 = vector.shape_cast %5 : vector<1x128x4xf32> to vector<128x4xf32>
    %cst_6 = arith.constant dense<0.000000e+00> : vector<40x4xf32>
    %7 = tpu.matmul %4, %6, %cst_6 {dimension_numbers = #tpu.dot_dimension_numbers<[1], [0], [0], [1], [0, 0, 1, 1], [], []>} : vector<40x128xf32>, vector<128x4xf32>, vector<40x4xf32> -> vector<40x4xf32>
    %8 = arith.addf %3, %7 : vector<40x4xf32>
    %9 = math.sin %0 : vector<40x128xf32>
    %c2 = arith.constant 2 : index
    %c0_7 = arith.constant 0 : index
    %c0_8 = arith.constant 0 : index
    %10 = vector.load %arg2[%c2, %c0_7, %c0_8] : memref<3x128x4xf32, #tpu.memory_space<vmem>>, vector<1x128x4xf32>
    %11 = vector.shape_cast %10 : vector<1x128x4xf32> to vector<128x4xf32>
    %cst_9 = arith.constant dense<0.000000e+00> : vector<40x4xf32>
    %12 = tpu.matmul %9, %11, %cst_9 {dimension_numbers = #tpu.dot_dimension_numbers<[1], [0], [0], [1], [0, 0, 1, 1], [], []>} : vector<40x128xf32>, vector<128x4xf32>, vector<40x4xf32> -> vector<40x4xf32>
    %13 = arith.addf %8, %12 : vector<40x4xf32>
    %c0_10 = arith.constant 0 : index
    %14 = memref.load %arg3[%c0_10] : memref<1xf32, #tpu.memory_space<smem>>
    %15 = vector.broadcast %14 : f32 to vector<40x4xf32>
    %16 = arith.addf %13, %15 : vector<40x4xf32>
    %17 = arith.negf %16 : vector<40x4xf32>
    %18 = math.exp %17 : vector<40x4xf32>
    %cst_11 = arith.constant 1.000000e+00 : f32
    %19 = vector.broadcast %cst_11 : f32 to vector<40x4xf32>
    %20 = arith.addf %19, %18 : vector<40x4xf32>
    %21 = arith.divf %19, %20 : vector<40x4xf32>
    %c0_12 = arith.constant 0 : index
    %c0_13 = arith.constant 0 : index
    %22 = vector.load %arg4[%c0_12, %c0_13] : memref<40x4xf32, #tpu.memory_space<vmem>>, vector<40x4xf32>
    tpu.vector_store %arg4[%c0_12, %c0_13], %21 {strides = array<i32>} : memref<40x4xf32, #tpu.memory_space<vmem>>, vector<40x4xf32>,
    return
  }
  func.func @transform_0(%arg0: i32) -> (i32, i32) {
    %c0_i32 = arith.constant 0 : i32
    %c0_i32_0 = arith.constant 0 : i32
    return %arg0, %c0_i32 : i32, i32
  }
  func.func @transform_1(%arg0: i32) -> (i32, i32, i32) {
    %c0_i32 = arith.constant 0 : i32
    %c0_i32_0 = arith.constant 0 : i32
    %c0_i32_1 = arith.constant 0 : i32
    %c0_i32_2 = arith.constant 0 : i32
    return %c0_i32, %c0_i32_0, %c0_i32_1 : i32, i32, i32
  }
  func.func @transform_2(%arg0: i32) -> i32 {
    %c0_i32 = arith.constant 0 : i32
    %c0_i32_0 = arith.constant 0 : i32
    return %c0_i32 : i32
  }
  func.func @transform_3(%arg0: i32) -> (i32, i32) {
    %c0_i32 = arith.constant 0 : i32
    %c0_i32_0 = arith.constant 0 : i32
    return %arg0, %c0_i32 : i32, i32
  }
}

</mosaic_0001>

<bundles_post_ra>
// kernel: tpu_custom_call.1
= control target key start
LH: loop header
LB: loop body
LE: loop exit
PB: predicated region body
PF: predicated region fallthrough
CT: control target
= control target key end

     0   :  { %s1426_s14 = smov 0   ;;  %s2151_s0 = inlined_call_operand.vmem [shape: f32[75,128], index: 0, kind: input, shape index: {}]   ;;  %s2152_s1 = inlined_call_operand.vmem [shape: f32[3,128,4], index: 1, kind: input, shape index: {}]   ;;  %s2153_s2 = inlined_call_operand.<no memory space> [shape: f32[1], index: 2, kind: input, shape index: {}]   ;;  %s2154_s3 = inlined_call_operand.vmem [shape: f32[75,4], index: 3, kind: output, shape index: {}]  }
   0x1   :  { %8 = sst [smem:[#allocation2]] %s2153_s2 }
   0x2 LB: > { %s1275_s15 = sadd.s32 4294967295, %s1394_s14   ;;  %p1279_p0 = scmp.ge.s32.totalorder %s1394_s14, 1  ;;  %s1394_s14 = sphi %s1426_s14, %s14_s14  }
   0x3   : > { %p139_p1 = scmp.lt.s32.totalorder %s1394_s14, 3 }
   0x5   : > { %p140_p2 = pnand %p1279_p0, %p139_p1 }
   0x6   : > { %s163_s21 = smul.u32 (!%p140_p2), 5, %s1275_s15 }
   0x7   : > { %143 = sbr.rel (%p140_p2) target bundleno = 416 (0x1a0), region = 32 }
   0x8   : > { %p164_p3 = scmp.lt.s32.totalorder (!%p140_p2), %s163_s21, 9 }
   0xc   : > { %v1328_v0 = vld [vmem:[%s2152_s1 + $0x178] sm:$0xff]  ;;  %v1327_v1 = vld [vmem:[%s2152_s1 + $0x170] sm:$0xff]  ;;  %v1326_v5 = vld [vmem:[%s2152_s1 + $0x168] sm:$0xff]  ;;  %s2164_s21 = smov (!%p164_p3, %s163_s21), 9 }
   0xd   : > { %v1297_v2 = vld [vmem:[%s2152_s1 + $0xf8] sm:$0xff]  ;;  %1074 = vmatpush.msra.mxu2 %v1328_v0  ;;  %v1296_v4 = vld [vmem:[%s2152_s1 + $0xf0] sm:$0xff]  ;;  %v1295_v7 = vld [vmem:[%s2152_s1 + $0xe8] sm:$0xff]  ;;  %s1280_s24 = sshll.u32 %s2164_s21, 3 }
   0xe   : > { %218 = vmatpush.msra.mxu0 %v1297_v2  ;;  %v195_v3 = vld [vmem:[%s2152_s1 + $0x78] sm:$0xff]  ;;  %1336 = vmatpush.msra.mxu3 %v1297_v2  ;;  %v194_v6 = vld [vmem:[%s2152_s1 + $0x70] sm:$0xff]  ;;  %v193_v8 = vld [vmem:[%s2152_s1 + $0x68] sm:$0xff]  ;;  %s1505_s8 = scalar_lea.vmem %s2151_s0, %s1280_s24  ;;  %s2133_s2 = scalar_lea.vmem %s2154_s3, %s1280_s24 }
   0xf   : > { %250 = vmatpush.msra.mxu1 %v195_v3  ;;  %1075 = vmatpush.msra.mxu2 %v1327_v1  ;;  %v1325_v9 = vld [vmem:[%s2152_s1 + $0x160] sm:$0xff]  ;;  %v1324_v12 = vld [vmem:[%s2152_s1 + $0x158] sm:$0xff]  ;;  %v1323_v15 = vld [vmem:[%s2152_s1 + $0x150] sm:$0xff] }
  0x10   : > { %219 = vmatpush.msra.mxu0 %v1296_v4  ;;  %1337 = vmatpush.msra.mxu3 %v1296_v4  ;;  %v1294_v10 = vld [vmem:[%s2152_s1 + $0xe0] sm:$0xff]  ;;  %v1293_v13 = vld [vmem:[%s2152_s1 + $0xd8] sm:$0xff]  ;;  %v1292_v16 = vld [vmem:[%s2152_s1 + $0xd0] sm:$0xff] }
  0x11   : > { %251 = vmatpush.msra.mxu1 %v194_v6  ;;  %1076 = vmatpush.msra.mxu2 %v1326_v5  ;;  %v192_v11 = vld [vmem:[%s2152_s1 + $0x60] sm:$0xff]  ;;  %v191_v14 = vld [vmem:[%s2152_s1 + $0x58] sm:$0xff]  ;;  %v190_v17 = vld [vmem:[%s2152_s1 + $0x50] sm:$0xff] }
  0x12   : > { %220 = vmatpush.msra.mxu0 %v1295_v7  ;;  %1338 = vmatpush.msra.mxu3 %v1295_v7  ;;  %v1322_v18 = vld [vmem:[%s2152_s1 + $0x148] sm:$0xff]  ;;  %v1321_v21 = vld [vmem:[%s2152_s1 + $0x140] sm:$0xff]  ;;  %v1320_v24 = vld [vmem:[%s2152_s1 + $0x138] sm:$0xff]  ;;  %v1396_v7 = vmov 683565275  }
  0x13   : > { %252 = vmatpush.msra.mxu1 %v193_v8  ;;  %1077 = vmatpush.msra.mxu2 %v1325_v9  ;;  %v1291_v19 = vld [vmem:[%s2152_s1 + $0xc8] sm:$0xff]  ;;  %v1290_v22 = vld [vmem:[%s2152_s1 + $0xc0] sm:$0xff]  ;;  %v1289_v25 = vld [vmem:[%s2152_s1 + $0xb8] sm:$0xff]  ;;  %v1397_v9 = vmov 2475754826  }
  0x14   : > { %221 = vmatpush.msra.mxu0 %v1294_v10  ;;  %1339 = vmatpush.msra.mxu3 %v1294_v10  ;;  %v189_v20 = vld [vmem:[%s2152_s1 + $0x48] sm:$0xff]  ;;  %v188_v23 = vld [vmem:[%s2152_s1 + $0x40] sm:$0xff]  ;;  %v187_v27 = vld [vmem:[%s2152_s1 + $0x38] sm:$0xff] }
  0x15   : > { %253 = vmatpush.msra.mxu1 %v192_v11  ;;  %1078 = vmatpush.msra.mxu2 %v1324_v12  ;;  %v1523_v26 = vld [vmem:[%s1505_s8] sm:$0xff]  ;;  %v1531_v30 = vld [vmem:[%s1505_s8 + $0x8] sm:$0xff]  ;;  %v1534_v31 = vld [vmem:[%s1505_s8 + $0x10] sm:$0xff]  ;;  %v1398_v11 = vmov 2131351028  }
  0x16   : > { %222 = vmatpush.msra.mxu0 %v1293_v13  ;;  %1340 = vmatpush.msra.mxu3 %v1293_v13  ;;  %v282_v28 = vand.u32 2147483647, %v1523_v26  ;;  %v285_v29 = vand.u32 2139095040, %v1523_v26  ;;  %v1319_v32 = vld [vmem:[%s2152_s1 + $0x130] sm:$0xff]  ;;  %v440_v34 = vand.u32 2139095040, %v1531_v30  ;;  %v595_v36 = vand.u32 2139095040, %v1534_v31 }
  0x17   : > { %254 = vmatpush.msra.mxu1 %v191_v14  ;;  %1079 = vmatpush.msra.mxu2 %v1323_v15  ;;  %v1288_v33 = vld [vmem:[%s2152_s1 + $0xb0] sm:$0xff]  ;;  %v437_v35 = vand.u32 2147483647, %v1531_v30  ;;  %v1318_v40 = vld [vmem:[%s2152_s1 + $0x128] sm:$0xff]  ;;  %v1317_v46 = vld [vmem:[%s2152_s1 + $0x120] sm:$0xff] }
  0x18   : > { %223 = vmatpush.msra.mxu0 %v1292_v16  ;;  %1341 = vmatpush.msra.mxu3 %v1292_v16  ;;  %v186_v37 = vld [vmem:[%s2152_s1 + $0x30] sm:$0xff]  ;;  %v286_v38 = vshrl.u32 %v285_v29, 23  ;;  %v289_v39 = vand.u32 8388607, %v282_v28  ;;  %v1287_v41 = vld [vmem:[%s2152_s1 + $0xa8] sm:$0xff]  ;;  %v441_v42 = vshrl.u32 %v440_v34, 23 }
  0x19   : > { %255 = vmatpush.msra.mxu1 %v190_v17  ;;  %1080 = vmatpush.msra.mxu2 %v1322_v18  ;;  %v444_v43 = vand.u32 8388607, %v437_v35  ;;  %v185_v44 = vld [vmem:[%s2152_s1 + $0x28] sm:$0xff]  ;;  %v1286_v47 = vld [vmem:[%s2152_s1 + $0xa0] sm:$0xff]  ;;  %v596_v50 = vshrl.u32 %v595_v36, 23  ;;  %v1316_v53 = vld [vmem:[%s2152_s1 + $0x118] sm:$0xff] }
  0x1a   : > { %224 = vmatpush.msra.mxu0 %v1291_v19  ;;  %1342 = vmatpush.msra.mxu3 %v1291_v19  ;;  %v1298_v45 = vadd.s32 4294967169, %v286_v38  ;;  %v290_v48 = vor.u32 8388608, %v289_v39  ;;  %v1301_v49 = vadd.s32 4294967169, %v441_v42  ;;  %v184_v51 = vld [vmem:[%s2152_s1 + $0x20] sm:$0xff]  ;;  %v1285_v54 = vld [vmem:[%s2152_s1 + $0x98] sm:$0xff]  ;;  %v1315_v58 = vld [vmem:[%s2152_s1 + $0x110] sm:$0xff] }
  0x1b   : > { %256 = vmatpush.msra.mxu1 %v189_v20  ;;  %1081 = vmatpush.msra.mxu2 %v1321_v21  ;;  %v445_v56 = vor.u32 8388608, %v444_v43  ;;  %v183_v57 = vld [vmem:[%s2152_s1 + $0x18] sm:$0xff]  ;;  %v1284_v59 = vld [vmem:[%s2152_s1 + $0x90] sm:$0xff]  ;;  %v1304_v62 = vadd.s32 4294967169, %v596_v50  ;;  %v1314_v2 = vld [vmem:[%s2152_s1 + $0x108] sm:$0xff] }
  0x1c   : > { %225 = vmatpush.msra.mxu0 %v1290_v22  ;;  %1343 = vmatpush.msra.mxu3 %v1290_v22  ;;  %v292_v52 = vadd.s32 1, %v1298_v45  ;;  %v447_v55 = vadd.s32 1, %v1301_v49  ;;  %v1585_v61 = vshll.u32 %v290_v48, 8  ;;  %v182_v63 = vld [vmem:[%s2152_s1 + $0x10] sm:$0xff]  ;;  %v1313_v13 = vld [vmem:[%s2152_s1 + $0x100] sm:$0xff] }
  0x1d   : > { %257 = vmatpush.msra.mxu1 %v188_v23  ;;  %1082 = vmatpush.msra.mxu2 %v1320_v24  ;;  %v1597_v5 = vshll.u32 %v445_v56, 8  ;;  %v1399_v14 = vmov 2102212464   ;;  %v1400_v16 = vmov 920167782   ;;  %v1608_v19 = vadd.s32 1, %v1304_v62 }
  0x1e   : > { %226 = vmatpush.msra.mxu0 %v1289_v25  ;;  %1344 = vmatpush.msra.mxu3 %v1289_v25  ;;  %vm293_vm0 = vcmp.gt.s32.totalorder %v292_v52, 0  ;;  %vm448_vm1 = vcmp.gt.s32.totalorder %v447_v55, 0  ;;  %v331_v18 = vand.u32 65535, %v1585_v61  ;;  %v332_v23 = vshrl.u32 %v1585_v61, 16 }
  0x1f   : > { %258 = vmatpush.msra.mxu1 %v187_v27  ;;  %1083 = vmatpush.msra.mxu2 %v1319_v32  ;;  %v294_v60 = vsel %vm293_vm0, %v292_v52, 0  ;;  %v449_v1 = vsel %vm448_vm1, %v447_v55, 0  ;;  %v1401_v25 = vmov 1326507024   ;;  %vm603_vm15 = vcmp.gt.s32.totalorder %v1608_v19, 0 }
  0x20   : > { %227 = vmatpush.msra.mxu0 %v1288_v33  ;;  %1345 = vmatpush.msra.mxu3 %v1288_v33  ;;  %v296_v0 = vand.u32 31, %v294_v60  ;;  %v1593_v3 = vshrl.u32 %v294_v60, 5  ;;  %v1595_v4 = vand.u32 31, %v449_v1 }
  0x21   : > { %259 = vmatpush.msra.mxu1 %v186_v37  ;;  %1084 = vmatpush.msra.mxu2 %v1318_v40 }
  0x22   : > { %228 = vmatpush.msra.mxu0 %v1287_v41  ;;  %1346 = vmatpush.msra.mxu3 %v1287_v41  ;;  %v297_v6 = vsub.s32 32, %v296_v0  ;;  %v299_v8 = vshll.u32 %v1396_v7, %v296_v0  ;;  %v302_v10 = vshll.u32 %v1397_v9, %v296_v0  ;;  %v305_v12 = vshll.u32 %v1398_v11, %v296_v0 }
  0x23   : > { %260 = vmatpush.msra.mxu1 %v185_v44  ;;  %1085 = vmatpush.msra.mxu2 %v1317_v46  ;;  %v308_v15 = vshll.u32 %v1399_v14, %v296_v0  ;;  %v311_v17 = vshll.u32 %v1400_v16, %v296_v0  ;;  %vm314_vm2 = vcmp.lt.s32.totalorder %v1593_v3, 1  ;;  %vm317_vm3 = vcmp.lt.s32.totalorder %v1593_v3, 4 }
  0x24   : > { %229 = vmatpush.msra.mxu0 %v1286_v47  ;;  %1347 = vmatpush.msra.mxu3 %v1286_v47  ;;  %v300_v20 = vshrl.u32 %v1397_v9, %v297_v6  ;;  %v303_v21 = vshrl.u32 %v1398_v11, %v297_v6  ;;  %v306_v22 = vshrl.u32 %v1399_v14, %v297_v6  ;;  %v1619_v34 = vsub.s32 32, %v1595_v4 }
  0x25   : > { %261 = vmatpush.msra.mxu1 %v184_v51  ;;  %1086 = vmatpush.msra.mxu2 %v1316_v53  ;;  %v309_v24 = vshrl.u32 %v1400_v16, %v297_v6  ;;  %v312_v27 = vshrl.u32 %v1401_v25, %v297_v6  ;;  %v298_v36 = vshrl.u32 %v1396_v7, %v297_v6  ;;  %vm316_vm4 = vcmp.lt.s32.totalorder %v1593_v3, 3 }
  0x26   : > { %230 = vmatpush.msra.mxu0 %v1285_v54  ;;  %1348 = vmatpush.msra.mxu3 %v1285_v54  ;;  %v301_v29 = vor.u32 %v300_v20, %v299_v8  ;;  %v304_v32 = vor.u32 %v303_v21, %v302_v10  ;;  %v307_v33 = vor.u32 %v306_v22, %v305_v12  ;;  %vm315_vm5 = vcmp.lt.s32.totalorder %v1593_v3, 2 }
  0x27   : > { %262 = vmatpush.msra.mxu1 %v183_v57  ;;  %1087 = vmatpush.msra.mxu2 %v1315_v58  ;;  %v310_v37 = vor.u32 %v309_v24, %v308_v15  ;;  %v313_v38 = vor.u32 %v312_v27, %v311_v17  ;;  %v1628_v41 = vshrl.u32 %v449_v1, 5  ;;  %v454_v44 = vshll.u32 %v1396_v7, %v1595_v4 }
  0x28   : > { %231 = vmatpush.msra.mxu0 %v1284_v59  ;;  %1349 = vmatpush.msra.mxu3 %v1284_v59  ;;  %v322_v39 = vsel %vm314_vm2, %v301_v29, %v304_v32  ;;  %v326_v40 = vsel %vm314_vm2, %v304_v32, %v307_v33  ;;  %v457_v45 = vshll.u32 %v1397_v9, %v1595_v4  ;;  %v319_v46 = vsel %vm317_vm3, %v307_v33, 2102212464 }
  0x29   : > { %263 = vmatpush.msra.mxu1 %v182_v63  ;;  %1088 = vmatpush.msra.mxu2 %v1314_v2  ;;  %v323_v42 = vsel %vm317_vm3, %v310_v37, 920167782  ;;  %v327_v43 = vsel %vm317_vm3, %v313_v38, 1326507024  ;;  %v455_v49 = vshrl.u32 %v1397_v9, %v1619_v34  ;;  %v318_v50 = vsel %vm314_vm2, %v298_v36, %v301_v29 }
  0x2a   : > { %v324_v47 = vsel %vm316_vm4, %v307_v33, %v323_v42  ;;  %v328_v48 = vsel %vm316_vm4, %v310_v37, %v327_v43  ;;  %v458_v53 = vshrl.u32 %v1398_v11, %v1619_v34  ;;  %v320_v58 = vsel %vm316_vm4, %v304_v32, %v319_v46 }
  0x2b   : > { %1089 = vmatpush.msra.mxu2 %v1313_v13  ;;  %v325_v51 = vsel %vm315_vm5, %v322_v39, %v324_v47  ;;  %v329_v52 = vsel %vm315_vm5, %v326_v40, %v328_v48  ;;  %v1656_v59 = vor.u32 %v455_v49, %v454_v44  ;;  %v460_v62 = vshll.u32 %v1398_v11, %v1595_v4 }
  0x2c   : > { %v333_v54 = vand.u32 65535, %v329_v52  ;;  %v334_v55 = vshrl.u32 %v329_v52, 16  ;;  %v355_v56 = vand.u32 65535, %v325_v51  ;;  %v356_v57 = vshrl.u32 %v325_v51, 16 }
  0x2d   : > { %v1658_v60 = vor.u32 %v458_v53, %v457_v45  ;;  %v461_v2 = vshrl.u32 %v1399_v14, %v1619_v34  ;;  %v463_v33 = vshll.u32 %v1399_v14, %v1595_v4  ;;  %v1402_v36 = vmov 0  }
  0x2e   : > { %v335_v63 = vmul.u32 %v333_v54, %v331_v18  ;;  %v336_v0 = vmul.u32 %v334_v55, %v331_v18  ;;  %v337_v1 = vmul.u32 %v333_v54, %v332_v23  ;;  %v338_v6 = vmul.u32 %v334_v55, %v332_v23 }
  0x2f   : > { %v357_v8 = vmul.u32 %v355_v56, %v331_v18  ;;  %v358_v10 = vmul.u32 %v356_v57, %v331_v18  ;;  %v359_v12 = vmul.u32 %v355_v56, %v332_v23  ;;  %v360_v20 = vmul.u32 %v356_v57, %v332_v23 }
  0x30   : > { %v339_v13 = vshll.u32 %v336_v0, 16  ;;  %v340_v15 = vshrl.u32 %v336_v0, 16  ;;  %v341_v17 = vshll.u32 %v337_v1, 16  ;;  %v342_v21 = vshrl.u32 %v337_v1, 16 }
  0x31   : > { %v361_v22 = vshll.u32 %v358_v10, 16  ;;  %v362_v24 = vshrl.u32 %v358_v10, 16  ;;  %v363_v27 = vshll.u32 %v359_v12, 16  ;;  %v364_v32 = vshrl.u32 %v359_v12, 16 }
  0x32   : > { %vm343_vm6 = vc.u32 %v335_v63, %v339_v13  ;;  %v345_v29 = vadd.s32 %v339_v13, %v335_v63  ;;  %v464_v38 = vshrl.u32 %v1400_v16, %v1619_v34  ;;  %v466_v40 = vshll.u32 %v1400_v16, %v1595_v4 }
  0x33   : > { %v344_v37 = vsel %vm343_vm6, 1, %v1402_v36  ;;  %vm365_vm7 = vc.u32 %v357_v8, %v361_v22  ;;  %v367_v18 = vadd.s32 %v361_v22, %v357_v8  ;;  %v462_v44 = vor.u32 %v461_v2, %v460_v62 }
  0x34   : > { %v346_v39 = vadd.s32 %v344_v37, %v338_v6  ;;  %vm347_vm8 = vc.u32 %v345_v29, %v341_v17  ;;  %v366_v23 = vsel %vm365_vm7, 1, %v1402_v36  ;;  %v465_v47 = vor.u32 %v464_v38, %v463_v33 }
  0x35   : > { %v348_v42 = vsel %vm347_vm8, 1, %v1402_v36  ;;  %v368_v43 = vadd.s32 %v366_v23, %v360_v20  ;;  %vm369_vm9 = vc.u32 %v367_v18, %v363_v27  ;;  %v467_v48 = vshrl.u32 %v1401_v25, %v1619_v34 }
  0x36   : > { %v350_v45 = vadd.s32 %v348_v42, %v346_v39  ;;  %v370_v46 = vsel %vm369_vm9, 1, %v1402_v36  ;;  %v1676_v49 = vadd.s32 %v367_v18, %v363_v27  ;;  %vm469_vm10 = vcmp.lt.s32.totalorder %v1628_v41, 1 }
  0x37   : > { %v372_v51 = vadd.s32 %v370_v46, %v368_v43  ;;  %vm471_vm11 = vcmp.lt.s32.totalorder %v1628_v41, 3  ;;  %v468_v52 = vor.u32 %v467_v48, %v466_v40  ;;  %vm470_vm12 = vcmp.lt.s32.totalorder %v1628_v41, 2 }
  0x38   : > { %v351_v4 = vadd.s32 %v350_v45, %v340_v15  ;;  %vm472_vm13 = vcmp.lt.s32.totalorder %v1628_v41, 4  ;;  %v321_v53 = vsel %vm315_vm5, %v318_v50, %v320_v58  ;;  %v477_v55 = vsel %vm469_vm10, %v1656_v59, %v1658_v60 }
  0x39   : > { %v373_v54 = vadd.s32 %v372_v51, %v362_v24  ;;  %v478_v56 = vsel %vm472_vm13, %v465_v47, 920167782  ;;  %v481_v63 = vsel %vm469_vm10, %v1658_v60, %v462_v44  ;;  %v487_v3 = vshrl.u32 %v1597_v5, 16 }
  0x3a   : > { %v1690_v57 = vadd.s32 %v351_v4, %v342_v21  ;;  %v479_v62 = vsel %vm471_vm11, %v462_v44, %v478_v56  ;;  %v482_v0 = vsel %vm472_vm13, %v468_v52, 1326507024  ;;  %v486_v1 = vand.u32 65535, %v1597_v5 }
  0x3b   : > { %v374_v50 = vadd.s32 %v373_v54, %v364_v32  ;;  %v480_v58 = vsel %vm470_vm12, %v477_v55, %v479_v62  ;;  %v375_v2 = vmul.u32 %v1585_v61, %v321_v53  ;;  %v483_v6 = vsel %vm471_vm11, %v465_v47, %v482_v0 }
  0x3c   : > { %vm377_vm14 = vc.u32 %v1690_v57, %v1676_v49  ;;  %v510_v8 = vand.u32 65535, %v480_v58  ;;  %v484_v12 = vsel %vm470_vm12, %v481_v63, %v483_v6  ;;  %v511_v13 = vshrl.u32 %v480_v58, 16 }
  0x3d   : > { %v378_v10 = vadd.s32 1, %v374_v50  ;;  %v488_v15 = vand.u32 65535, %v484_v12  ;;  %v489_v17 = vshrl.u32 %v484_v12, 16  ;;  %v453_v33 = vshrl.u32 %v1396_v7, %v1619_v34 }
  0x3e   : > { %v514_v20 = vmul.u32 %v510_v8, %v487_v3  ;;  %v512_v22 = vmul.u32 %v510_v8, %v486_v1  ;;  %v513_v24 = vmul.u32 %v511_v13, %v486_v1  ;;  %v515_v37 = vmul.u32 %v511_v13, %v487_v3 }
  0x3f   : > { %v379_v21 = vsel %vm377_vm14, %v378_v10, %v374_v50  ;;  %v490_v27 = vmul.u32 %v488_v15, %v486_v1  ;;  %v491_v29 = vmul.u32 %v489_v17, %v486_v1  ;;  %v492_v32 = vmul.u32 %v488_v15, %v487_v3 }
  0x40   : > { %v380_v61 = vadd.s32 %v379_v21, %v375_v2  ;;  %v516_v18 = vshll.u32 %v513_v24, 16  ;;  %v518_v38 = vshll.u32 %v514_v20, 16  ;;  %v493_v23 = vmul.u32 %v489_v17, %v487_v3 }
  0x41   : > { %v494_v40 = vshll.u32 %v491_v29, 16  ;;  %v496_v42 = vshll.u32 %v492_v32, 16  ;;  %v474_v43 = vsel %vm472_vm13, %v462_v44, 2102212464  ;;  %v604_v46 = vsel %vm603_vm15, %v1608_v19, 0 }
  0x42   : > { %v381_v39 = vadd.s32 536870912, %v380_v61  ;;  %vm520_vm0 = vc.u32 %v512_v22, %v516_v18  ;;  %v522_v45 = vadd.s32 %v516_v18, %v512_v22  ;;  %v473_v51 = vsel %vm469_vm10, %v453_v33, %v1656_v59 }
  0x43   : > { %vm498_vm1 = vc.u32 %v490_v27, %v494_v40  ;;  %v500_v48 = vadd.s32 %v494_v40, %v490_v27  ;;  %v521_v34 = vsel %vm520_vm0, 1, %v1402_v36  ;;  %v495_v53 = vshrl.u32 %v491_v29, 16 }
  0x44   : > { %v382_v47 = vshrl.u32 %v381_v39, 30  ;;  %v499_v4 = vsel %vm498_vm1, 1, %v1402_v36  ;;  %v523_v52 = vadd.s32 %v521_v34, %v515_v37  ;;  %vm524_vm2 = vc.u32 %v522_v45, %v518_v38 }
  0x45   : > { %v501_v54 = vadd.s32 %v499_v4, %v493_v23  ;;  %vm502_vm3 = vc.u32 %v500_v48, %v496_v42  ;;  %v475_v19 = vsel %vm471_vm11, %v1658_v60, %v474_v43  ;;  %v517_v56 = vshrl.u32 %v513_v24, 16 }
  0x46   : > { %v383_v44 = vshll.u32 %v382_v47, 30  ;;  %v503_v55 = vsel %vm502_vm3, 1, %v1402_v36  ;;  %v525_v62 = vsel %vm524_vm2, 1, %v1402_v36  ;;  %v497_v3 = vshrl.u32 %v492_v32, 16 }
  0x47   : > { %v505_v59 = vadd.s32 %v503_v55, %v501_v54  ;;  %v606_v50 = vand.u32 31, %v604_v46  ;;  %v519_v58 = vshrl.u32 %v514_v20, 16  ;;  %v1728_v0 = vadd.s32 %v522_v45, %v518_v38 }
  0x48   : > { %v384_v63 = vsub.s32 %v380_v61, %v383_v44  ;;  %v527_v1 = vadd.s32 %v525_v62, %v523_v52  ;;  %v406_v6 = vsub.s32 4, %v382_v47  ;;  %v476_v60 = vsel %vm470_vm12, %v473_v51, %v475_v19 }
  0x49   : > { %v506_v8 = vadd.s32 %v505_v59, %v495_v53  ;;  %v592_v12 = vand.u32 2147483647, %v1534_v31  ;;  %vm284_vm5 = vcmp.lt.s32.totalorder %v1523_v26, 0  ;;  %v607_v17 = vsub.s32 32, %v606_v50  ;;  %v1283_v59 = vld [vmem:[%s2152_s1 + $0x88] sm:$0xff] }
  0x4a   : > { %vm385_vm4 = vcmp.lt.s32.totalorder %v384_v63, 0  ;;  %v386_v2 = vsub.s32 0, %v384_v63  ;;  %v528_v10 = vadd.s32 %v527_v1, %v517_v56  ;;  %vm1738_vm6 = vcmp.le.f32.partialorder %v282_v28, 0.7853982  ;;  %232 = vmatpush.msra.mxu0 %v1283_v59  ;;  %1350 = vmatpush.msra.mxu3 %v1283_v59 }
  0x4b   : > { %v1734_v15 = vadd.s32 %v506_v8, %v497_v3  ;;  %v376_v21 = vadd.s32 %v1676_v49, %v1690_v57  ;;  %v407_v24 = vsel %vm284_vm5, %v406_v6, %v382_v47  ;;  %v530_v61 = vmul.u32 %v1597_v5, %v476_v60  ;;  %v180_v60 = vld [vmem:[%s2152_s1] sm:$0xff] }
  0x4c   : > { %v387_v13 = vsel %vm385_vm4, %v386_v2, %v384_v63  ;;  %v529_v22 = vadd.s32 %v528_v10, %v519_v58  ;;  %v1749_v27 = vshrl.u32 %v604_v46, 5  ;;  %v1753_v32 = vand.u32 8388607, %v592_v12  ;;  %v1282_v58 = vld [vmem:[%s2152_s1 + $0x80] sm:$0xff] }
  0x4d   : > { %v388_v41 = vclz %v387_v13  ;;  %vm532_vm7 = vc.u32 %v1734_v15, %v1728_v0  ;;  %v609_v49 = vshll.u32 %v1396_v7, %v606_v50  ;;  %v610_v57 = vshrl.u32 %v1397_v9, %v607_v17  ;;  %233 = vmatpush.msra.mxu0 %v1282_v58  ;;  %1351 = vmatpush.msra.mxu3 %v1282_v58 }
  0x4e   : > { %v533_v28 = vadd.s32 1, %v529_v22  ;;  %v612_v33 = vshll.u32 %v1397_v9, %v606_v50  ;;  %v613_v37 = vshrl.u32 %v1398_v11, %v607_v17  ;;  %v615_v5 = vshll.u32 %v1398_v11, %v606_v50 }
  0x4f   : > { %v1299_v29 = vadd.s32 4294967294, %v388_v41  ;;  %v618_v38 = vshll.u32 %v1399_v14, %v606_v50  ;;  %v619_v39 = vshrl.u32 %v1400_v16, %v607_v17  ;;  %v616_v42 = vshrl.u32 %v1399_v14, %v607_v17 }
  0x50   : > { %v534_v18 = vsel %vm532_vm7, %v533_v28, %v529_v22  ;;  %v621_v43 = vshll.u32 %v1400_v16, %v606_v50  ;;  %v622_v48 = vshrl.u32 %v1401_v25, %v607_v17  ;;  %v409_v34 = vsel %vm1738_vm6, 0, %v407_v24  ;;  %v181_v50 = vld [vmem:[%s2152_s1 + $0x8] sm:$0xff] }
  0x51   : > { %vm1300_vm8 = vcmp.lt.s32.totalorder %v1299_v29, 0  ;;  %v535_v40 = vadd.s32 %v534_v18, %v530_v61  ;;  %v600_v44 = vor.u32 8388608, %v1753_v32  ;;  %v620_v53 = vor.u32 %v619_v39, %v618_v38  ;;  %264 = vmatpush.msra.mxu1 %v181_v50 }
  0x52   : > { %v391_v23 = vsel %vm1300_vm8, 0, %v1299_v29  ;;  %v611_v19 = vor.u32 %v610_v57, %v609_v49  ;;  %v614_v55 = vor.u32 %v613_v37, %v612_v33  ;;  %vm627_vm9 = vcmp.lt.s32.totalorder %v1749_v27, 4 }
  0x53   : > { %v392_v45 = vsub.s32 32, %v391_v23  ;;  %v393_v46 = vshll.u32 %v384_v63, %v391_v23  ;;  %v396_v47 = vsub.s32 4294967266, %v391_v23  ;;  %v536_v51 = vadd.s32 536870912, %v535_v40  ;;  %265 = vmatpush.msra.mxu1 %v180_v60 }
  0x54   : > { %v617_v63 = vor.u32 %v616_v42, %v615_v5  ;;  %v623_v3 = vor.u32 %v622_v48, %v621_v43  ;;  %v196_v1 = vmul.f32 %v1523_v26, %v1523_v26  ;;  %vm439_vm10 = vcmp.lt.s32.totalorder %v1531_v30, 0  ;;  %266 = vmatmul.f32.vlgmr.msra.gmra.mxu1 %v1523_v26 }
  0x55   : > { %v394_v4 = vshrl.u32 %v376_v21, %v392_v45  ;;  %v397_v52 = vadd.s32 127, %v396_v47  ;;  %v537_v54 = vshrl.u32 %v536_v51, 30  ;;  %vm624_vm11 = vcmp.lt.s32.totalorder %v1749_v27, 1 }
  0x56   : > { %vm626_vm12 = vcmp.lt.s32.totalorder %v1749_v27, 3  ;;  %v608_v10 = vshrl.u32 %v1396_v7, %v607_v17  ;;  %v633_v13 = vsel %vm627_vm9, %v620_v53, 920167782  ;;  %v426_v21 = vadd.s32 3, %v409_v34  ;;  %234 = vmatmul.f32.vlgmr.msra.gmra.mxu0 %v196_v1 }
  0x57   : > { %v395_v56 = vor.u32 %v394_v4, %v393_v46  ;;  %v398_v62 = vshll.u32 %v397_v52, 23  ;;  %v538_v2 = vshll.u32 %v537_v54, 30  ;;  %v197_v41 = vmul.f32 %v1531_v30, %v1531_v30 }
  0x58   : > { %vm625_vm13 = vcmp.lt.s32.totalorder %v1749_v27, 2  ;;  %vm1796_vm14 = vcmp.le.f32.partialorder %v437_v35, 0.7853982  ;;  %v632_v17 = vsel %vm624_vm11, %v611_v19, %v614_v55  ;;  %v634_v29 = vsel %vm626_vm12, %v617_v63, %v633_v13 }
  0x59   : > { %v399_v6 = vor.u32 4788187, %v398_v62  ;;  %v402_v8 = vcvt.s32.f32 %v395_v56  ;;  %v1791_v22 = vsub.s32 %v535_v40, %v538_v2  ;;  %v636_v28 = vsel %vm624_vm11, %v614_v55, %v617_v63  ;;  %237 = vmatmul.f32.vlgmr.msra.gmra.mxu3 %v197_v41 }
  0x5a   : > { %v637_v35 = vsel %vm627_vm9, %v623_v3, 1326507024  ;;  %v1811_v49 = vshll.u32 %v600_v44, 8  ;;  %v561_v33 = vsub.s32 4, %v537_v54  ;;  %v629_v37 = vsel %vm627_vm9, %v617_v63, 2102212464 }
  0x5b   : > { %v400_v24 = vand.u32 2147483647, %v399_v6  ;;  %vm540_vm15 = vcmp.lt.s32.totalorder %v1791_v22, 0  ;;  %v541_v32 = vsub.s32 0, %v1791_v22  ;;  %v638_v5 = vsel %vm626_vm12, %v620_v53, %v637_v35 }
  0x5c   : > { %v635_v38 = vsel %vm625_vm13, %v632_v17, %v634_v29  ;;  %v639_v39 = vsel %vm625_vm13, %v636_v28, %v638_v5  ;;  %v641_v23 = vand.u32 65535, %v1811_v49  ;;  %v531_v46 = vadd.s32 %v1728_v0, %v1734_v15  ;;  %269 = vmatmul.f32.gmra.mxu1 %v1531_v30 }
  0x5d   : > { %v403_v57 = vmul.f32 %v402_v8, %v400_v24  ;;  %v542_v18 = vsel %vm540_vm15, %v541_v32, %v1791_v22  ;;  %v643_v43 = vand.u32 65535, %v639_v39  ;;  %v644_v45 = vshrl.u32 %v639_v39, 16 }
  0x5e   : > { %v543_v42 = vclz %v542_v18  ;;  %v628_v47 = vsel %vm624_vm11, %v608_v10, %v611_v19  ;;  %v630_v48 = vsel %vm626_vm12, %v614_v55, %v629_v37  ;;  %v642_v34 = vshrl.u32 %v1811_v49, 16 }
  0x5f   : > { %v404_v40 = vxor.u32 2147483648, %v403_v57  ;;  %v1834_v52 = vsel %vm439_vm10, %v561_v33, %v537_v54  ;;  %v1836_v44 = vmul.u32 %v644_v45, %v641_v23  ;;  %v1843_v15 = vand.u32 3, %v426_v21 }
  0x60   : > { %v1302_v4 = vadd.s32 4294967294, %v543_v42  ;;  %v665_v53 = vand.u32 65535, %v635_v38  ;;  %v666_v19 = vshrl.u32 %v635_v38, 16  ;;  %v1849_v56 = vsel %vm625_vm13, %v628_v47, %v630_v48 }
  0x61   : > { %v405_v51 = vsel %vm284_vm5, %v404_v40, %v403_v57  ;;  %v645_v54 = vmul.u32 %v643_v43, %v641_v23  ;;  %v564_v20 = vsel %vm1796_vm14, 0, %v1834_v52  ;;  %v1855_v63 = vmul.u32 %v643_v43, %v642_v34 }
  0x62   : > { %v1841_v0 = vsel %vm1738_vm6, %v1523_v26, %v405_v51  ;;  %vm1303_vm0 = vcmp.lt.s32.totalorder %v1302_v4, 0  ;;  %v649_v3 = vshll.u32 %v1836_v44, 16  ;;  %v648_v2 = vmul.u32 %v644_v45, %v642_v34 }
  0x63   : > { %v410_v55 = vmul.f32 %v1841_v0, %v1841_v0  ;;  %v546_v62 = vsel %vm1303_vm0, 0, %v1302_v4  ;;  %v667_v6 = vmul.u32 %v665_v53, %v641_v23  ;;  %v1859_v8 = vmul.u32 %v666_v19, %v641_v23 }
  0x64   : > { %v547_v58 = vsub.s32 32, %v546_v62  ;;  %v548_v1 = vshll.u32 %v1791_v22, %v546_v62  ;;  %v551_v27 = vsub.s32 4294967266, %v546_v62  ;;  %vm653_vm1 = vc.u32 %v645_v54, %v649_v3  ;;  %272 = vmatmul.f32.gmra.mxu1 %v1534_v31 }
  0x65   : > { %v411_v59 = vmul.f32 -0.001358992, %v410_v55  ;;  %v418_v50 = vmul.f32 -0.00019511016, %v410_v55  ;;  %vm432_vm2 = vcmp.eq.s32.totalorder %v1843_v15, 2  ;;  %v651_v41 = vshll.u32 %v1855_v63, 16 }
  0x66   : > { %v549_v13 = vshrl.u32 %v531_v46, %v547_v58  ;;  %v552_v21 = vadd.s32 127, %v551_v27  ;;  %v1863_v24 = vmul.u32 %v665_v53, %v642_v34  ;;  %v670_v17 = vmul.u32 %v666_v19, %v642_v34 }
  0x67   : > { %v412_v60 = vadd.f32 0.041655596, %v411_v59  ;;  %v419_v10 = vadd.f32 0.008332121, %v418_v50  ;;  %v654_v32 = vsel %vm653_vm1, 1, %v1402_v36  ;;  %vm429_vm3 = vcmp.eq.s32.totalorder %v1843_v15, 0 }
  0x68   : > { %v550_v22 = vor.u32 %v549_v13, %v548_v1  ;;  %v553_v35 = vshll.u32 %v552_v21, 23  ;;  %v655_v57 = vadd.s32 %v649_v3, %v645_v54  ;;  %v656_v33 = vadd.s32 %v654_v32, %v648_v2  ;;  %v1879_v54 = vld [vmem:[%s1505_s8 + $0x18] sm:$0xff]  ;;  %v1889_v21 = vld [vmem:[%s1505_s8 + $0x20] sm:$0xff] }
  0x69   : > { %v413_v29 = vmul.f32 %v412_v60, %v410_v55  ;;  %v420_v28 = vmul.f32 %v419_v10, %v410_v55  ;;  %v671_v37 = vshll.u32 %v1859_v8, 16  ;;  %vm428_vm4 = vcmp.lt.s32.totalorder %v1843_v15, 2 }
  0x6a   : > { %v198_v38 = vmul.f32 %v1534_v31, %v1534_v31  ;;  %v650_v39 = vshrl.u32 %v1836_v44, 16  ;;  %v554_v23 = vor.u32 4788187, %v553_v35  ;;  %v557_v40 = vcvt.s32.f32 %v550_v22 }
  0x6b   : > { %v414_v5 = vadd.f32 -0.4999988, %v413_v29  ;;  %v421_v18 = vadd.f32 -0.16666654, %v420_v28  ;;  %vm657_vm5 = vc.u32 %v655_v57, %v651_v41  ;;  %v673_v42 = vshll.u32 %v1863_v24, 16 }
  0x6c   : > { %240 = vmatmul.f32.gmra.mxu3 %v198_v38  ;;  %v652_v46 = vshrl.u32 %v1855_v63, 16  ;;  %v658_v47 = vsel %vm657_vm5, 1, %v1402_v36  ;;  %v555_v48 = vand.u32 2147483647, %v554_v23  ;;  %vm675_vm6 = vc.u32 %v667_v6, %v671_v37  ;;  %275 = vmatmul.f32.gmra.mxu1 %v1879_v54 }
  0x6d   : > { %v415_v43 = vmul.f32 %v414_v5, %v410_v55  ;;  %v422_v45 = vmul.f32 %v421_v18, %v410_v55  ;;  %v660_v34 = vadd.s32 %v658_v47, %v656_v33  ;;  %v677_v51 = vadd.s32 %v671_v37, %v667_v6 }
  0x6e   : > { %v672_v53 = vshrl.u32 %v1859_v8, 16  ;;  %v676_v19 = vsel %vm675_vm6, 1, %v1402_v36  ;;  %v558_v62 = vmul.f32 %v557_v40, %v555_v48  ;;  %v674_v50 = vshrl.u32 %v1863_v24, 16 }
  0x6f   : > { %v416_v4 = vadd.f32 1.0, %v415_v43  ;;  %v423_v44 = vadd.f32 1.0, %v422_v45  ;;  %v661_v55 = vadd.s32 %v660_v34, %v650_v39  ;;  %v678_v3 = vadd.s32 %v676_v19, %v670_v17 }
  0x70   : > { %vm679_vm7 = vc.u32 %v677_v51, %v673_v42  ;;  %v559_v1 = vxor.u32 2147483648, %v558_v62  ;;  %v681_v27 = vadd.s32 %v677_v51, %v673_v42  ;;  %v750_v6 = vand.u32 2139095040, %v1879_v54 }
  0x71   : > { %v424_v63 = vmul.f32 %v423_v44, %v1841_v0  ;;  %v433_v59 = vxor.u32 2147483648, %v416_v4  ;;  %v680_v58 = vsel %vm679_vm7, 1, %v1402_v36  ;;  %v662_v10 = vadd.s32 %v661_v55, %v652_v46 }
  0x72   : > { %v682_v2 = vadd.s32 %v680_v58, %v678_v3  ;;  %v747_v13 = vand.u32 2147483647, %v1879_v54  ;;  %vm425_vm8 = vweird.f32 %v1523_v26  ;;  %v560_v0 = vsel %vm439_vm10, %v559_v1, %v558_v62 }
  0x73   : > { %v430_v8 = vxor.u32 2147483648, %v424_v63  ;;  %v434_v60 = vsel %vm432_vm2, %v433_v59, %v424_v63  ;;  %v581_v41 = vadd.s32 3, %v564_v20  ;;  %v563_v29 = vsel %vm1796_vm14, %v1531_v30, %v560_v0 }
  0x74   : > { %v683_v24 = vadd.s32 %v682_v2, %v672_v53  ;;  %v685_v26 = vmul.u32 %v1811_v49, %v1849_v56  ;;  %v751_v28 = vshrl.u32 %v750_v6, 23  ;;  %v565_v32 = vmul.f32 %v563_v29, %v563_v29  ;;  %278 = vmatmul.f32.gmra.mxu1 %v1889_v21 }
  0x75   : > { %v431_v17 = vsel %vm429_vm3, %v416_v4, %v430_v8  ;;  %v905_v20 = vand.u32 2139095040, %v1889_v21  ;;  %vm687_vm9 = vc.u32 %v662_v10, %v681_v27  ;;  %v754_v33 = vand.u32 8388607, %v747_v13 }
  0x76   : > { %v435_v22 = vsel %vm428_vm4, %v431_v17, %v434_v60  ;;  %v684_v52 = vadd.s32 %v683_v24, %v674_v50  ;;  %v1307_v57 = vadd.s32 4294967169, %v751_v28  ;;  %v566_v61 = vmul.f32 -0.001358992, %v565_v32 }
  0x77   : > { %v436_v35 = vsel %vm425_vm8, nan, %v435_v22  ;;  %v573_v37 = vmul.f32 -0.00019511016, %v565_v32  ;;  %v582_v38 = vand.u32 3, %v581_v41  ;;  %v906_v23 = vshrl.u32 %v905_v20, 23 }
  0x78   : > { %1090 = vmatmul.f32.vlgmr.msra.gmra.mxu2 %v436_v35  ;;  %v688_v5 = vadd.s32 1, %v684_v52  ;;  %v757_v18 = vadd.s32 1, %v1307_v57  ;;  %v567_v49 = vadd.f32 0.041655596, %v566_v61  ;;  %v755_v45 = vor.u32 8388608, %v754_v33 }
  0x79   : > { %v574_v56 = vadd.f32 0.008332121, %v573_v37  ;;  %vm583_vm11 = vcmp.lt.s32.totalorder %v582_v38, 2  ;;  %vm584_vm12 = vcmp.eq.s32.totalorder %v582_v38, 0  ;;  %vm587_vm13 = vcmp.eq.s32.totalorder %v582_v38, 2 }
  0x7a   : > { %v689_v15 = vsel %vm687_vm9, %v688_v5, %v684_v52  ;;  %vm758_vm10 = vcmp.gt.s32.totalorder %v757_v18, 0  ;;  %v568_v40 = vmul.f32 %v567_v49, %v565_v32  ;;  %vm580_vm14 = vweird.f32 %v1531_v30 }
  0x7b   : > { %v690_v39 = vadd.s32 %v689_v15, %v685_v26  ;;  %v575_v42 = vmul.f32 %v574_v56, %v565_v32  ;;  %v759_v43 = vsel %vm758_vm10, %v757_v18, 0  ;;  %v1913_v51 = vadd.s32 %v681_v27, %v662_v10 }
  0x7c   : > { %v761_v47 = vand.u32 31, %v759_v43  ;;  %v569_v48 = vadd.f32 -0.4999988, %v568_v40  ;;  %v1310_v53 = vadd.s32 4294967169, %v906_v23  ;;  %v1916_v3 = vshll.u32 %v755_v45, 8 }
  0x7d   : > { %v691_v46 = vadd.s32 536870912, %v690_v39  ;;  %v576_v34 = vadd.f32 -0.16666654, %v575_v42  ;;  %v1921_v27 = vshrl.u32 %v759_v43, 5  ;;  %vm594_vm15 = vcmp.lt.s32.totalorder %v1534_v31, 0 }
  0x7e   : > { %v762_v44 = vsub.s32 32, %v761_v47  ;;  %v570_v19 = vmul.f32 %v569_v48, %v565_v32  ;;  %v764_v55 = vshll.u32 %v1396_v7, %v761_v47  ;;  %v767_v50 = vshll.u32 %v1397_v9, %v761_v47 }
  0x7f   : > { %v692_v4 = vshrl.u32 %v691_v46, 30  ;;  %v577_v62 = vmul.f32 %v576_v34, %v565_v32  ;;  %v773_v58 = vshll.u32 %v1399_v14, %v761_v47  ;;  %v770_v60 = vshll.u32 %v1398_v11, %v761_v47 }
  0x80   : > { %v765_v59 = vshrl.u32 %v1397_v9, %v762_v44  ;;  %v571_v1 = vadd.f32 1.0, %v570_v19  ;;  %v768_v6 = vshrl.u32 %v1398_v11, %v762_v44  ;;  %v771_v10 = vshrl.u32 %v1399_v14, %v762_v44 }
  0x81   : > { %v693_v63 = vshll.u32 %v692_v4, 30  ;;  %v578_v2 = vadd.f32 1.0, %v577_v62  ;;  %v774_v0 = vshrl.u32 %v1400_v16, %v762_v44  ;;  %v912_v26 = vadd.s32 1, %v1310_v53 }
  0x82   : > { %v588_v24 = vxor.u32 2147483648, %v571_v1  ;;  %v766_v17 = vor.u32 %v765_v59, %v764_v55  ;;  %v769_v22 = vor.u32 %v768_v6, %v767_v50  ;;  %v776_v35 = vshll.u32 %v1400_v16, %v761_v47 }
  0x83   : > { %v1924_v8 = vsub.s32 %v690_v39, %v693_v63  ;;  %v579_v41 = vmul.f32 %v578_v2, %v563_v29  ;;  %v775_v32 = vor.u32 %v774_v0, %v773_v58  ;;  %v777_v57 = vshrl.u32 %v1401_v25, %v762_v44 }
  0x84   : > { %v772_v33 = vor.u32 %v771_v10, %v770_v60  ;;  %vm779_vm1 = vcmp.lt.s32.totalorder %v1921_v27, 1  ;;  %vm781_vm2 = vcmp.lt.s32.totalorder %v1921_v27, 3  ;;  %vm1941_vm3 = vcmp.le.f32.partialorder %v592_v12, 0.7853982 }
  0x85   : > { %vm695_vm0 = vcmp.lt.s32.totalorder %v1924_v8, 0  ;;  %v696_v28 = vsub.s32 0, %v1924_v8  ;;  %v585_v52 = vxor.u32 2147483648, %v579_v41  ;;  %v589_v20 = vsel %vm587_vm13, %v588_v24, %v579_v41 }
  0x86   : > { %v778_v18 = vor.u32 %v777_v57, %v776_v35  ;;  %vm782_vm4 = vcmp.lt.s32.totalorder %v1921_v27, 4  ;;  %v716_v56 = vsub.s32 4, %v692_v4  ;;  %vm780_vm5 = vcmp.lt.s32.totalorder %v1921_v27, 2 }
  0x87   : > { %v697_v29 = vsel %vm695_vm0, %v696_v28, %v1924_v8  ;;  %v586_v61 = vsel %vm584_vm12, %v571_v1, %v585_v52  ;;  %v902_v15 = vand.u32 2147483647, %v1889_v21  ;;  %v787_v12 = vsel %vm779_vm1, %v766_v17, %v769_v22 }
  0x88   : > { %v698_v5 = vclz %v697_v29  ;;  %v590_v49 = vsel %vm583_vm11, %v586_v61, %v589_v20  ;;  %v788_v40 = vsel %vm782_vm4, %v775_v32, 920167782  ;;  %v791_v42 = vsel %vm779_vm1, %v769_v22, %v772_v33 }
  0x89   : > { %v591_v39 = vsel %vm580_vm14, nan, %v590_v49  ;;  %v789_v38 = vsel %vm781_vm2, %v772_v33, %v788_v40  ;;  %v796_v43 = vand.u32 65535, %v1916_v3  ;;  %v797_v45 = vshrl.u32 %v1916_v3, 16 }
  0x8a   : > { %v1305_v23 = vadd.s32 4294967294, %v698_v5  ;;  %1093 = vmatmul.f32.gmra.mxu2 %v591_v39  ;;  %v763_v30 = vshrl.u32 %v1396_v7, %v762_v44  ;;  %v792_v46 = vsel %vm782_vm4, %v778_v18, 1326507024  ;;  %vm913_vm7 = vcmp.gt.s32.totalorder %v912_v26, 0 }
  0x8b   : > { %v717_v48 = vsel %vm594_vm15, %v716_v56, %v692_v4  ;;  %v790_v34 = vsel %vm780_vm5, %v787_v12, %v789_v38  ;;  %v793_v53 = vsel %vm781_vm2, %v775_v32, %v792_v46  ;;  %v914_v50 = vsel %vm913_vm7, %v912_v26, 0 }
  0x8c   : > { %vm1306_vm6 = vcmp.lt.s32.totalorder %v1305_v23, 0  ;;  %v794_v44 = vsel %vm780_vm5, %v791_v42, %v793_v53  ;;  %v820_v59 = vand.u32 65535, %v790_v34  ;;  %v1975_v58 = vand.u32 8388607, %v902_v15 }
  0x8d   : > { %v701_v47 = vsel %vm1306_vm6, 0, %v1305_v23  ;;  %v798_v63 = vand.u32 65535, %v794_v44  ;;  %v784_v2 = vsel %vm782_vm4, %v772_v33, 2102212464  ;;  %v799_v6 = vshrl.u32 %v794_v44, 16 }
  0x8e   : > { %v702_v19 = vsub.s32 32, %v701_v47  ;;  %v703_v62 = vshll.u32 %v1924_v8, %v701_v47  ;;  %v706_v55 = vsub.s32 4294967266, %v701_v47  ;;  %v719_v8 = vsel %vm1941_vm3, 0, %v717_v48 }
  0x8f   : > { %v783_v60 = vsel %vm779_vm1, %v763_v30, %v766_v17  ;;  %v802_v10 = vmul.u32 %v798_v63, %v797_v45  ;;  %v821_v0 = vshrl.u32 %v790_v34, 16  ;;  %v800_v26 = vmul.u32 %v798_v63, %v796_v43 }
  0x90   : > { %v704_v4 = vshrl.u32 %v1913_v51, %v702_v19  ;;  %v707_v1 = vadd.s32 127, %v706_v55  ;;  %v801_v28 = vmul.u32 %v799_v6, %v796_v43  ;;  %v199_v51 = vmul.f32 %v1879_v54, %v1879_v54 }
  0x91   : > { %v785_v32 = vsel %vm781_vm2, %v769_v22, %v784_v2  ;;  %v803_v52 = vmul.u32 %v799_v6, %v797_v45  ;;  %v824_v20 = vmul.u32 %v820_v59, %v797_v45  ;;  %v806_v33 = vshll.u32 %v802_v10, 16 }
  0x92   : > { %v705_v41 = vor.u32 %v704_v4, %v703_v62  ;;  %v708_v24 = vshll.u32 %v707_v1, 23  ;;  %v804_v29 = vshll.u32 %v801_v28, 16  ;;  %v736_v61 = vadd.s32 3, %v719_v8  ;;  %243 = vmatmul.f32.gmra.mxu3 %v199_v51  ;;  %v2003_v4 = vld [vmem:[%s1505_s8 + $0x10] sm:$0xff]  ;;  %s1111_s8 = sld [smem:[#allocation2]] }
  0x93   : > { %v822_v17 = vmul.u32 %v820_v59, %v796_v43  ;;  %v823_v5 = vmul.u32 %v821_v0, %v796_v43  ;;  %v916_v18 = vand.u32 31, %v914_v50  ;;  %v1990_v56 = vsel %vm780_vm5, %v783_v60, %v785_v32 }
  0x94   : > { %v709_v35 = vor.u32 4788187, %v708_v24  ;;  %v712_v57 = vcvt.s32.f32 %v705_v41  ;;  %vm808_vm8 = vc.u32 %v800_v26, %v804_v29  ;;  %v810_v39 = vadd.s32 %v804_v29, %v800_v26 }
  0x95   : > { %v809_v22 = vsel %vm808_vm8, 1, %v1402_v36  ;;  %v825_v23 = vmul.u32 %v821_v0, %v797_v45  ;;  %v826_v12 = vshll.u32 %v823_v5, 16  ;;  %v828_v40 = vshll.u32 %v824_v20, 16 }
  0x96   : > { %v710_v49 = vand.u32 2147483647, %v709_v35  ;;  %v805_v42 = vshrl.u32 %v801_v28, 16  ;;  %v811_v30 = vadd.s32 %v809_v22, %v803_v52  ;;  %vm812_vm9 = vc.u32 %v810_v39, %v806_v33 }
  0x97   : > { %v1993_v46 = vand.u32 3, %v736_v61  ;;  %v813_v43 = vsel %vm812_vm9, 1, %v1402_v36  ;;  %vm830_vm10 = vc.u32 %v822_v17, %v826_v12  ;;  %v832_v27 = vadd.s32 %v826_v12, %v822_v17 }
  0x98   : > { %v713_v38 = vmul.f32 %v712_v57, %v710_v49  ;;  %v807_v48 = vshrl.u32 %v802_v10, 16  ;;  %v815_v34 = vadd.s32 %v813_v43, %v811_v30  ;;  %v831_v53 = vsel %vm830_vm10, 1, %v1402_v36 }
  0x99   : > { %v827_v19 = vshrl.u32 %v823_v5, 16  ;;  %v833_v45 = vadd.s32 %v831_v53, %v825_v23  ;;  %vm834_vm11 = vc.u32 %v832_v27, %v828_v40  ;;  %v1997_v62 = vsub.s32 32, %v916_v18 }
  0x9a   : > { %v714_v47 = vxor.u32 2147483648, %v713_v38  ;;  %v816_v44 = vadd.s32 %v815_v34, %v805_v42  ;;  %v829_v63 = vshrl.u32 %v824_v20, 16  ;;  %v835_v59 = vsel %vm834_vm11, 1, %v1402_v36 }
  0x9b   : > { %v837_v2 = vadd.s32 %v835_v59, %v833_v45  ;;  %v840_v6 = vmul.u32 %v1916_v3, %v1990_v56  ;;  %v2010_v8 = vshrl.u32 %v914_v50, 5  ;;  %v2014_v31 = vadd.s32 %v832_v27, %v828_v40 }
  0x9c   : > { %v715_v55 = vsel %vm594_vm15, %v714_v47, %v713_v38  ;;  %v2012_v10 = vadd.s32 %v816_v44, %v807_v48  ;;  %v922_v0 = vshll.u32 %v1397_v9, %v916_v18  ;;  %v923_v24 = vshrl.u32 %v1398_v11, %v1997_v62 }
  0x9d   : > { %v718_v1 = vsel %vm1941_vm3, %v2003_v4, %v715_v55  ;;  %v838_v41 = vadd.s32 %v837_v2, %v827_v19  ;;  %v925_v37 = vshll.u32 %v1398_v11, %v916_v18  ;;  %v926_v26 = vshrl.u32 %v1399_v14, %v1997_v62 }
  0x9e   : > { %v720_v60 = vmul.f32 %v718_v1, %v718_v1  ;;  %v919_v50 = vshll.u32 %v1396_v7, %v916_v18  ;;  %v920_v51 = vshrl.u32 %v1397_v9, %v1997_v62  ;;  %v928_v52 = vshll.u32 %v1399_v14, %v916_v18 }
  0x9f   : > { %v839_v32 = vadd.s32 %v838_v41, %v829_v63  ;;  %v929_v20 = vshrl.u32 %v1400_v16, %v1997_v62  ;;  %v931_v35 = vshll.u32 %v1400_v16, %v916_v18  ;;  %vm842_vm12 = vc.u32 %v2012_v10, %v2014_v31 }
  0xa0   : > { %v721_v28 = vmul.f32 -0.001358992, %v720_v60  ;;  %v728_v3 = vmul.f32 -0.00019511016, %v720_v60  ;;  %v932_v29 = vshrl.u32 %v1401_v25, %v1997_v62  ;;  %v2033_v61 = vor.u32 %v923_v24, %v922_v0 }
  0xa1   : > { %v843_v33 = vadd.s32 1, %v839_v32  ;;  %v2035_v9 = vor.u32 %v926_v26, %v925_v37  ;;  %vm934_vm13 = vcmp.lt.s32.totalorder %v2010_v8, 1  ;;  %vm937_vm14 = vcmp.lt.s32.totalorder %v2010_v8, 4 }
  0xa2   : > { %v722_v57 = vadd.f32 0.041655596, %v721_v28  ;;  %v729_v11 = vadd.f32 0.008332121, %v728_v3  ;;  %v933_v5 = vor.u32 %v932_v29, %v931_v35  ;;  %v910_v18 = vor.u32 8388608, %v1975_v58 }
  0xa3   : > { %v844_v16 = vsel %vm842_vm12, %v843_v33, %v839_v32  ;;  %v2040_v49 = vor.u32 %v920_v51, %v919_v50  ;;  %v930_v56 = vor.u32 %v929_v20, %v928_v52  ;;  %vm936_vm15 = vcmp.lt.s32.totalorder %v2010_v8, 3 }
  0xa4   : > { %v723_v14 = vmul.f32 %v722_v57, %v720_v60  ;;  %v730_v17 = vmul.f32 %v729_v11, %v720_v60  ;;  %v845_v22 = vadd.s32 %v844_v16, %v840_v6  ;;  %vm935_vm0 = vcmp.lt.s32.totalorder %v2010_v8, 2 }
  0xa5   : > { %v946_v23 = vsel %vm934_vm13, %v2033_v61, %v2035_v9  ;;  %v947_v12 = vsel %vm937_vm14, %v933_v5, 1326507024  ;;  %vm742_vm1 = vcmp.eq.s32.totalorder %v1993_v46, 2  ;;  %v942_v42 = vsel %vm934_vm13, %v2040_v49, %v2033_v61 }
  0xa6   : > { %v724_v39 = vadd.f32 -0.4999988, %v723_v14  ;;  %v731_v25 = vadd.f32 -0.16666654, %v730_v17  ;;  %v846_v38 = vadd.s32 536870912, %v845_v22  ;;  %v948_v43 = vsel %vm936_vm15, %v930_v56, %v947_v12 }
  0xa7   : > { %v943_v30 = vsel %vm937_vm14, %v930_v56, 920167782  ;;  %v2059_v27 = vshll.u32 %v910_v18, 8  ;;  %v949_v53 = vsel %vm935_vm0, %v946_v23, %v948_v43  ;;  %vm739_vm2 = vcmp.eq.s32.totalorder %v1993_v46, 0 }
  0xa8   : > { %v725_v40 = vmul.f32 %v724_v39, %v720_v60  ;;  %v732_v58 = vmul.f32 %v731_v25, %v720_v60  ;;  %v2061_v34 = vshrl.u32 %v846_v38, 30  ;;  %v953_v55 = vand.u32 65535, %v949_v53 }
  0xa9   : > { %v951_v19 = vand.u32 65535, %v2059_v27  ;;  %v952_v45 = vshrl.u32 %v2059_v27, 16  ;;  %v954_v44 = vshrl.u32 %v949_v53, 16  ;;  %v944_v6 = vsel %vm936_vm15, %v2035_v9, %v943_v30 }
  0xaa   : > { %v726_v47 = vadd.f32 1.0, %v725_v40  ;;  %v733_v48 = vadd.f32 1.0, %v732_v58  ;;  %v848_v2 = vshll.u32 %v2061_v34, 30  ;;  %vm738_vm3 = vcmp.lt.s32.totalorder %v1993_v46, 2 }
  0xab   : > { %v955_v60 = vmul.u32 %v953_v55, %v951_v19  ;;  %v956_v0 = vmul.u32 %v954_v44, %v951_v19  ;;  %v2072_v41 = vmul.u32 %v953_v55, %v952_v45  ;;  %vm735_vm4 = vweird.f32 %v2003_v4 }
  0xac   : > { %v734_v63 = vmul.f32 %v733_v48, %v718_v1  ;;  %v743_v59 = vxor.u32 2147483648, %v726_v47  ;;  %v849_v1 = vsub.s32 %v845_v22, %v848_v2  ;;  %v945_v26 = vsel %vm935_vm0, %v942_v42, %v944_v6 }
  0xad   : > { %v959_v28 = vshll.u32 %v956_v0, 16  ;;  %v958_v51 = vmul.u32 %v954_v44, %v952_v45  ;;  %v961_v52 = vshll.u32 %v2072_v41, 16  ;;  %v975_v4 = vand.u32 65535, %v945_v26 }
  0xae   : > { %v740_v24 = vxor.u32 2147483648, %v734_v63  ;;  %v744_v37 = vsel %vm742_vm1, %v743_v59, %v734_v63  ;;  %vm850_vm5 = vcmp.lt.s32.totalorder %v849_v1, 0  ;;  %v851_v50 = vsub.s32 0, %v849_v1 }
  0xaf   : > { %vm963_vm6 = vc.u32 %v955_v60, %v959_v28  ;;  %v965_v57 = vadd.s32 %v959_v28, %v955_v60  ;;  %v976_v29 = vshrl.u32 %v945_v26, 16  ;;  %v979_v16 = vmul.u32 %v975_v4, %v952_v45 }
  0xb0   : > { %v741_v3 = vsel %vm739_vm2, %v726_v47, %v740_v24  ;;  %v852_v35 = vsel %vm850_vm5, %v851_v50, %v849_v1  ;;  %v964_v46 = vsel %vm963_vm6, 1, %v1402_v36  ;;  %v841_v18 = vadd.s32 %v2014_v31, %v2012_v10 }
  0xb1   : > { %v745_v32 = vsel %vm738_vm3, %v741_v3, %v744_v37  ;;  %v853_v11 = vclz %v852_v35  ;;  %v966_v33 = vadd.s32 %v964_v46, %v958_v51  ;;  %vm967_vm7 = vc.u32 %v965_v57, %v961_v52 }
  0xb2   : > { %v746_v20 = vsel %vm735_vm4, nan, %v745_v32  ;;  %v968_v17 = vsel %vm967_vm7, 1, %v1402_v36  ;;  %v978_v5 = vmul.u32 %v976_v29, %v951_v19  ;;  %v977_v56 = vmul.u32 %v975_v4, %v951_v19 }
  0xb3   : > { %1096 = vmatmul.f32.gmra.mxu2 %v746_v20  ;;  %v1308_v14 = vadd.s32 4294967294, %v853_v11  ;;  %v960_v22 = vshrl.u32 %v956_v0, 16  ;;  %v970_v23 = vadd.s32 %v968_v17, %v966_v33  ;;  %v980_v12 = vmul.u32 %v976_v29, %v952_v45 }
  0xb4   : > { %v981_v39 = vshll.u32 %v978_v5, 16  ;;  %v983_v42 = vshll.u32 %v979_v16, 16  ;;  %v918_v30 = vshrl.u32 %v1396_v7, %v1997_v62  ;;  %v939_v43 = vsel %vm937_vm14, %v2035_v9, 2102212464 }
  0xb5   : > { %vm1309_vm8 = vcmp.lt.s32.totalorder %v1308_v14, 0  ;;  %v962_v48 = vshrl.u32 %v2072_v41, 16  ;;  %v971_v53 = vadd.s32 %v970_v23, %v960_v22  ;;  %v982_v19 = vshrl.u32 %v978_v5, 16 }
  0xb6   : > { %v856_v25 = vsel %vm1309_vm8, 0, %v1308_v14  ;;  %vm985_vm9 = vc.u32 %v977_v56, %v981_v39  ;;  %v987_v31 = vadd.s32 %v981_v39, %v977_v56  ;;  %v200_v7 = vmul.f32 %v1889_v21, %v1889_v21 }
  0xb7   : > { %v857_v40 = vsub.s32 32, %v856_v25  ;;  %v858_v58 = vshll.u32 %v849_v1, %v856_v25  ;;  %v861_v38 = vsub.s32 4294967266, %v856_v25  ;;  %v986_v45 = vsel %vm985_vm9, 1, %v1402_v36 }
  0xb8   : > { %v988_v63 = vadd.s32 %v986_v45, %v980_v12  ;;  %vm989_vm10 = vc.u32 %v987_v31, %v983_v42  ;;  %v938_v62 = vsel %vm934_vm13, %v918_v30, %v2040_v49  ;;  %v940_v9 = vsel %vm936_vm15, %v2033_v61, %v939_v43  ;;  %246 = vmatmul.f32.gmra.mxu3 %v200_v7 }
  0xb9   : > { %v859_v47 = vshrl.u32 %v841_v18, %v857_v40  ;;  %v862_v10 = vadd.s32 127, %v861_v38  ;;  %v990_v59 = vsel %vm989_vm10, 1, %v1402_v36  ;;  %v984_v60 = vshrl.u32 %v979_v16, 16 }
  0xba   : > { %v992_v0 = vadd.s32 %v990_v59, %v988_v63  ;;  %v972_v41 = vadd.s32 %v971_v53, %v962_v48  ;;  %v991_v24 = vadd.s32 %v987_v31, %v983_v42  ;;  %v941_v1 = vsel %vm935_vm0, %v938_v62, %v940_v9 }
  0xbb   : > { %v860_v55 = vor.u32 %v859_v47, %v858_v58  ;;  %v863_v44 = vshll.u32 %v862_v10, 23  ;;  %vm749_vm11 = vcmp.lt.s32.totalorder %v1879_v54, 0  ;;  %v871_v61 = vsub.s32 4, %v2061_v34 }
  0xbc   : > { %v993_v26 = vadd.s32 %v992_v0, %v982_v19  ;;  %v995_v36 = vmul.u32 %v2059_v27, %v941_v1  ;;  %vm997_vm12 = vc.u32 %v972_v41, %v991_v24  ;;  %vm2108_vm13 = vcmp.le.f32.partialorder %v747_v13, 0.7853982 }
  0xbd   : > { %v864_v2 = vor.u32 4788187, %v863_v44  ;;  %v867_v6 = vcvt.s32.f32 %v860_v55  ;;  %v872_v52 = vsel %vm749_vm11, %v871_v61, %v2061_v34  ;;  %v996_v31 = vadd.s32 %v991_v24, %v972_v41 }
  0xbe   : > { %v994_v49 = vadd.s32 %v993_v26, %v984_v60  ;;  %v874_v57 = vsel %vm2108_vm13, 0, %v872_v52  ;;  %vm890_vm3 = vweird.f32 %v1879_v54  ;;  %vm904_vm4 = vcmp.lt.s32.totalorder %v1889_v21, 0 }
  0xbf   : > { %v865_v37 = vand.u32 2147483647, %v864_v2  ;;  %v891_v14 = vadd.s32 3, %v874_v57  ;;  %vm903_vm5 = vcmp.le.f32.partialorder %v902_v15, 0.7853982  ;;  %vm1045_vm9 = vweird.f32 %v1889_v21 }
  0xc0   : > { %v998_v51 = vadd.s32 1, %v994_v49 }
  0xc1   : > { %v868_v28 = vmul.f32 %v867_v6, %v865_v37  ;;  %v892_v39 = vand.u32 3, %v891_v14 }
  0xc2   : > { %v999_v32 = vsel %vm997_vm12, %v998_v51, %v994_v49 }
  0xc3   : > { %v869_v50 = vxor.u32 2147483648, %v868_v28  ;;  %v1000_v35 = vadd.s32 %v999_v32, %v995_v36  ;;  %vm897_vm15 = vcmp.eq.s32.totalorder %v892_v39, 2  ;;  %vm893_vm0 = vcmp.lt.s32.totalorder %v892_v39, 2 }
  0xc4   : > { %vm894_vm1 = vcmp.eq.s32.totalorder %v892_v39, 0 }
  0xc5   : > { %v870_v8 = vsel %vm749_vm11, %v869_v50, %v868_v28  ;;  %v1001_v27 = vadd.s32 536870912, %v1000_v35 }
  0xc6   : > { %v873_v20 = vsel %vm2108_vm13, %v1879_v54, %v870_v8  ;;  %vm1213_vm13 = vcmask 31744  }
  0xc7   : > { %v875_v46 = vmul.f32 %v873_v20, %v873_v20  ;;  %v1002_v4 = vshrl.u32 %v1001_v27, 30 }
  0xc9   : > { %v876_v13 = vmul.f32 -0.001358992, %v875_v46  ;;  %v883_v11 = vmul.f32 -0.00019511016, %v875_v46  ;;  %v1003_v17 = vshll.u32 %v1002_v4, 30  ;;  %v1026_v41 = vsub.s32 4, %v1002_v4 }
  0xcb   : > { %v877_v29 = vadd.f32 0.041655596, %v876_v13  ;;  %v884_v33 = vadd.f32 0.008332121, %v883_v11  ;;  %v1004_v34 = vsub.s32 %v1000_v35, %v1003_v17  ;;  %v1027_v37 = vsel %vm904_vm4, %v1026_v41, %v1002_v4 }
  0xcc   : > { %v1029_v28 = vsel %vm903_vm5, 0, %v1027_v37 }
  0xcd   : > { %v878_v5 = vmul.f32 %v877_v29, %v875_v46  ;;  %v885_v16 = vmul.f32 %v884_v33, %v875_v46  ;;  %vm1005_vm14 = vcmp.lt.s32.totalorder %v1004_v34, 0  ;;  %v1006_v25 = vsub.s32 0, %v1004_v34 }
  0xce   : > { %v1046_v50 = vadd.s32 3, %v1029_v28 }
  0xcf   : > { %v879_v18 = vadd.f32 -0.4999988, %v878_v5  ;;  %v886_v56 = vadd.f32 -0.16666654, %v885_v16  ;;  %v1007_v12 = vsel %vm1005_vm14, %v1006_v25, %v1004_v34  ;;  %v2123_v5 = vstv %s1111_s8 }
  0xd0   : > { %v1008_v38 = vclz %v1007_v12 }
  0xd1   : > { %v880_v22 = vmul.f32 %v879_v18, %v875_v46  ;;  %v887_v23 = vmul.f32 %v886_v56, %v875_v46  ;;  %v267_v27 = vpop.f32.mrf.mxu1 }
  0xd2   : > { %v1311_v43 = vadd.s32 4294967294, %v1008_v38 }
  0xd3   : > { %v881_v40 = vadd.f32 1.0, %v880_v22  ;;  %v888_v58 = vadd.f32 1.0, %v887_v23  ;;  %v235_v46 = vpop.f32.mrf.mxu0 }
  0xd4   : > { %vm1312_vm2 = vcmp.lt.s32.totalorder %v1311_v43, 0  ;;  %v268_v11 = vadd.f32 %v267_v27, %v235_v46 }
  0xd5   : > { %v889_v42 = vmul.f32 %v888_v58, %v873_v20  ;;  %v898_v30 = vxor.u32 2147483648, %v881_v40  ;;  %v1011_v48 = vsel %vm1312_vm2, 0, %v1311_v43  ;;  %v1047_v20 = vand.u32 3, %v1046_v50 }
  0xd6   : > { %v1012_v19 = vsub.s32 32, %v1011_v48  ;;  %v1013_v45 = vshll.u32 %v1004_v34, %v1011_v48  ;;  %v1016_v55 = vsub.s32 4294967266, %v1011_v48 }
  0xd7   : > { %v895_v47 = vxor.u32 2147483648, %v889_v42  ;;  %v899_v10 = vsel %vm897_vm15, %v898_v30, %v889_v42  ;;  %vm1052_vm6 = vcmp.eq.s32.totalorder %v1047_v20, 2  ;;  %vm1049_vm7 = vcmp.eq.s32.totalorder %v1047_v20, 0 }
  0xd8   : > { %v1014_v7 = vshrl.u32 %v996_v31, %v1012_v19  ;;  %v1017_v62 = vadd.s32 127, %v1016_v55  ;;  %vm1048_vm8 = vcmp.lt.s32.totalorder %v1047_v20, 2 }
  0xd9   : > { %v896_v53 = vsel %vm894_vm1, %v881_v40, %v895_v47  ;;  %v270_v12 = vpop.f32.mrf.mxu1 }
  0xda   : > { %v900_v44 = vsel %vm893_vm0, %v896_v53, %v899_v10  ;;  %v1015_v9 = vor.u32 %v1014_v7, %v1013_v45  ;;  %v1018_v59 = vshll.u32 %v1017_v62, 23 }
  0xdb   : > { %v901_v63 = vsel %vm890_vm3, nan, %v900_v44 }
  0xdc   : > { %1099 = vmatmul.f32.gmra.mxu2 %v901_v63  ;;  %v1019_v2 = vor.u32 4788187, %v1018_v59  ;;  %v1022_v6 = vcvt.s32.f32 %v1015_v9  ;;  %v238_v23 = vpop.f32.mrf.mxu3 }
  0xdd   : > { %v271_v58 = vadd.f32 %v270_v12, %v238_v23 }
  0xde   : > { %v1020_v60 = vand.u32 2147483647, %v1019_v2 }
  0xe0   : > { %v1023_v0 = vmul.f32 %v1022_v6, %v1020_v60 }
  0xe2   : > { %v1024_v54 = vxor.u32 2147483648, %v1023_v0 }
  0xe4   : > { %v1025_v24 = vsel %vm904_vm4, %v1024_v54, %v1023_v0 }
  0xe5   : > { %v1028_v1 = vsel %vm903_vm5, %v1889_v21, %v1025_v24 }
  0xe6   : > { %v1030_v26 = vmul.f32 %v1028_v1, %v1028_v1 }
  0xe8   : > { %v1031_v49 = vmul.f32 -0.001358992, %v1030_v26  ;;  %v1038_v61 = vmul.f32 -0.00019511016, %v1030_v26 }
  0xea   : > { %v1032_v36 = vadd.f32 0.041655596, %v1031_v49  ;;  %v1039_v3 = vadd.f32 0.008332121, %v1038_v61 }
  0xec   : > { %v1033_v51 = vmul.f32 %v1032_v36, %v1030_v26  ;;  %v1040_v8 = vmul.f32 %v1039_v3, %v1030_v26 }
  0xee   : > { %v1034_v32 = vadd.f32 -0.4999988, %v1033_v51  ;;  %v1041_v52 = vadd.f32 -0.16666654, %v1040_v8 }
  0xef   : > { %v241_v37 = vpop.f32.mrf.mxu3 }
  0xf0   : > { %v1035_v35 = vmul.f32 %v1034_v32, %v1030_v26  ;;  %v1042_v15 = vmul.f32 %v1041_v52, %v1030_v26 }
  0xf2   : > { %v1036_v57 = vadd.f32 1.0, %v1035_v35  ;;  %v1043_v13 = vadd.f32 1.0, %v1042_v15 }
  0xf4   : > { %v1044_v4 = vmul.f32 %v1043_v13, %v1028_v1  ;;  %v1053_v29 = vxor.u32 2147483648, %v1036_v57  ;;  %v273_v1 = vpop.f32.mrf.mxu1 }
  0xf5   : > { %v274_v26 = vadd.f32 %v273_v1, %v241_v37 }
  0xf6   : > { %v1050_v33 = vxor.u32 2147483648, %v1044_v4  ;;  %v1054_v14 = vsel %vm1052_vm6, %v1053_v29, %v1044_v4 }
  0xf8   : > { %v1051_v34 = vsel %vm1049_vm7, %v1036_v57, %v1050_v33 }
  0xf9   : > { %v1055_v18 = vsel %vm1048_vm8, %v1051_v34, %v1054_v14 }
  0xfa   : > { %v1056_v39 = vsel %vm1045_vm9, nan, %v1055_v18 }
  0xfb   : > { %v1091_v17 = vpop.f32.mrf.mxu2  ;;  %1102 = vmatmul.f32.gmra.mxu2 %v1056_v39 }
  0xfc   : > { %v1106_v16 = vadd.f32 %v1091_v17, %v268_v11  ;;  %v276_v11 = vpop.f32.mrf.mxu1 }
  0xfe   : > { %v1113_v56 = vadd.f32 %v2123_v5, %v1106_v16 }
 0x100   : > { %v1329_v25 = vmul.f32 -1.442695, %v1113_v56 }
 0x102   : > { %1367 = vpow2.f32 %v1329_v25 }
 0x108   : > { %v1368_v22 = vpop.eup %1367 }
 0x109   : > { %v1133_v40 = vadd.f32 1.0, %v1368_v22 }
 0x10b   : > { %1369 = vrcp.f32 %v1133_v40  ;;  %v1149_v31 = vand.u32 2147483648, %v1133_v40  ;;  %v1147_v53 = vand.u32 2147483647, %v1133_v40  ;;  %vm1143_vm11 = vweird.f32 %v1133_v40 }
 0x10d   : > { %v1094_v38 = vpop.f32.mrf.mxu2  ;;  %v1150_v45 = vor.u32 1.1754944e-38, %v1149_v31  ;;  %vm1148_vm14 = vcmp.eq.f32.partialorder %v1147_v53, 8.507059e+37 }
 0x10e   : > { %v1107_v42 = vadd.f32 %v1094_v38, %v271_v58 }
 0x110   : > { %v1114_v21 = vadd.f32 %v2123_v5, %v1107_v42 }
 0x111   : > { %v1370_v30 = vpop.eup %1369 }
 0x112   : > { %v1139_v43 = vmul.f32 %v1370_v30, %v1133_v40  ;;  %v1330_v47 = vmul.f32 -1.442695, %v1114_v21  ;;  %vm1144_vm10 = vweird.f32 %v1370_v30  ;;  %v279_v40 = vpop.f32.mrf.mxu1 }
 0x113   : > { %vm1145_vm12 = vmor %vm1143_vm11, %vm1144_vm10 }
 0x114   : > { %v1140_v10 = vsub.f32 1.0, %v1139_v43  ;;  %1371 = vpow2.f32 %v1330_v47 }
 0x115   : > { %v244_v13 = vpop.f32.mrf.mxu3 }
 0x116   : > { %v1141_v48 = vmul.f32 %v1370_v30, %v1140_v10  ;;  %v277_v4 = vadd.f32 %v276_v11, %v244_v13 }
 0x118   : > { %v1142_v19 = vadd.f32 %v1370_v30, %v1141_v48 }
 0x11a   : > { %v1146_v55 = vsel %vm1145_vm12, %v1370_v30, %v1142_v19  ;;  %v1372_v44 = vpop.eup %1371 }
 0x11b   : > { %v1151_v63 = vsel %vm1148_vm14, %v1150_v45, %v1146_v55  ;;  %v1134_v7 = vadd.f32 1.0, %v1372_v44 }
 0x11c   : > { %1214 = vst.msk [vmem:[%s2133_s2] sm:$0xff] %vm1213_vm13, %v1151_v63 }
 0x11d   : > { %1373 = vrcp.f32 %v1134_v7  ;;  %v1164_v2 = vand.u32 2147483648, %v1134_v7  ;;  %v1162_v60 = vand.u32 2147483647, %v1134_v7  ;;  %vm1158_vm0 = vweird.f32 %v1134_v7 }
 0x11f   : > { %v1165_v41 = vor.u32 1.1754944e-38, %v1164_v2  ;;  %vm1163_vm2 = vcmp.eq.f32.partialorder %v1162_v60, 8.507059e+37 }
 0x123   : > { %v1374_v62 = vpop.eup %1373 }
 0x124   : > { %v1154_v9 = vmul.f32 %v1374_v62, %v1134_v7  ;;  %vm1159_vm15 = vweird.f32 %v1374_v62 }
 0x125   : > { %vm1160_vm1 = vmor %vm1158_vm0, %vm1159_vm15 }
 0x126   : > { %v1155_v59 = vsub.f32 1.0, %v1154_v9 }
 0x128   : > { %v1156_v6 = vmul.f32 %v1374_v62, %v1155_v59 }
 0x12a   : > { %v1157_v0 = vadd.f32 %v1374_v62, %v1156_v6 }
 0x12c   : > { %v1161_v54 = vsel %vm1160_vm1, %v1374_v62, %v1157_v0 }
 0x12d   : > { %v1166_v24 = vsel %vm1163_vm2, %v1165_v41, %v1161_v54 }
 0x12e   : > { %1215 = vst.msk [vmem:[%s2133_s2 + $0x8] sm:$0xff] %vm1213_vm13, %v1166_v24 }
 0x136   : > { %v1097_v28 = vpop.f32.mrf.mxu2 }
 0x137   : > { %v1108_v49 = vadd.f32 %v1097_v28, %v274_v26 }
 0x139   : > { %v1115_v61 = vadd.f32 %v2123_v5, %v1108_v49 }
 0x13b   : > { %v1331_v36 = vmul.f32 -1.442695, %v1115_v61  ;;  %v247_v12 = vpop.f32.mrf.mxu3 }
 0x13c   : > { %v280_v30 = vadd.f32 %v279_v40, %v247_v12 }
 0x13d   : > { %1375 = vpow2.f32 %v1331_v36 }
 0x143   : > { %v1376_v3 = vpop.eup %1375 }
 0x144   : > { %v1135_v50 = vadd.f32 1.0, %v1376_v3 }
 0x146   : > { %1377 = vrcp.f32 %v1135_v50  ;;  %v1179_v52 = vand.u32 2147483648, %v1135_v50  ;;  %v1177_v35 = vand.u32 2147483647, %v1135_v50  ;;  %vm1173_vm4 = vweird.f32 %v1135_v50 }
 0x148   : > { %v1180_v46 = vor.u32 1.1754944e-38, %v1179_v52  ;;  %vm1178_vm6 = vcmp.eq.f32.partialorder %v1177_v35, 8.507059e+37 }
 0x14c   : > { %v1378_v51 = vpop.eup %1377 }
 0x14d   : > { %v1169_v8 = vmul.f32 %v1378_v51, %v1135_v50  ;;  %vm1174_vm3 = vweird.f32 %v1378_v51 }
 0x14e   : > { %vm1175_vm5 = vmor %vm1173_vm4, %vm1174_vm3 }
 0x14f   : > { %v1170_v32 = vsub.f32 1.0, %v1169_v8 }
 0x151   : > { %v1171_v20 = vmul.f32 %v1378_v51, %v1170_v32 }
 0x153   : > { %v1172_v15 = vadd.f32 %v1378_v51, %v1171_v20 }
 0x155   : > { %v1176_v27 = vsel %vm1175_vm5, %v1378_v51, %v1172_v15 }
 0x156   : > { %v1181_v57 = vsel %vm1178_vm6, %v1180_v46, %v1176_v27 }
 0x157   : > { %1216 = vst.msk [vmem:[%s2133_s2 + $0x10] sm:$0xff] %vm1213_vm13, %v1181_v57 }
 0x15f   : > { %v1100_v29 = vpop.f32.mrf.mxu2 }
 0x160   : > { %v1109_v33 = vadd.f32 %v1100_v29, %v277_v4 }
 0x162   : > { %v1116_v14 = vadd.f32 %v2123_v5, %v1109_v33 }
 0x164   : > { %v1332_v17 = vmul.f32 -1.442695, %v1116_v14 }
 0x166   : > { %1379 = vpow2.f32 %v1332_v17 }
 0x16c   : > { %v1380_v16 = vpop.eup %1379 }
 0x16d   : > { %v1136_v34 = vadd.f32 1.0, %v1380_v16 }
 0x16f   : > { %1381 = vrcp.f32 %v1136_v34  ;;  %v1194_v25 = vand.u32 2147483648, %v1136_v34  ;;  %v1192_v23 = vand.u32 2147483647, %v1136_v34  ;;  %vm1188_vm8 = vweird.f32 %v1136_v34 }
 0x171   : > { %v1195_v38 = vor.u32 1.1754944e-38, %v1194_v25  ;;  %vm1193_vm10 = vcmp.eq.f32.partialorder %v1192_v23, 8.507059e+37 }
 0x175   : > { %v1382_v18 = vpop.eup %1381 }
 0x176   : > { %v1184_v56 = vmul.f32 %v1382_v18, %v1136_v34  ;;  %vm1189_vm7 = vweird.f32 %v1382_v18 }
 0x177   : > { %vm1190_vm9 = vmor %vm1188_vm8, %vm1189_vm7 }
 0x178   : > { %v1185_v39 = vsub.f32 1.0, %v1184_v56 }
 0x17a   : > { %v1186_v22 = vmul.f32 %v1382_v18, %v1185_v39 }
 0x17c   : > { %v1187_v58 = vadd.f32 %v1382_v18, %v1186_v22 }
 0x17e   : > { %v1191_v42 = vsel %vm1190_vm9, %v1382_v18, %v1187_v58  ;;  %v1103_v43 = vpop.f32.mrf.mxu2 }
 0x17f   : > { %v1196_v21 = vsel %vm1193_vm10, %v1195_v38, %v1191_v42  ;;  %v1110_v47 = vadd.f32 %v1103_v43, %v280_v30 }
 0x180   : > { %1217 = vst.msk [vmem:[%s2133_s2 + $0x18] sm:$0xff] %vm1213_vm13, %v1196_v21 }
 0x181   : > { %v1117_v10 = vadd.f32 %v2123_v5, %v1110_v47 }
 0x183   : > { %v1333_v31 = vmul.f32 -1.442695, %v1117_v10 }
 0x185   : > { %1383 = vpow2.f32 %v1333_v31 }
 0x18b   : > { %v1384_v48 = vpop.eup %1383 }
 0x18c   : > { %v1137_v53 = vadd.f32 1.0, %v1384_v48 }
 0x18e   : > { %1385 = vrcp.f32 %v1137_v53  ;;  %v1209_v44 = vand.u32 2147483648, %v1137_v53  ;;  %v1207_v7 = vand.u32 2147483647, %v1137_v53  ;;  %vm1203_vm12 = vweird.f32 %v1137_v53 }
 0x190   : > { %v1210_v9 = vor.u32 1.1754944e-38, %v1209_v44  ;;  %vm1208_vm15 = vcmp.eq.f32.partialorder %v1207_v7, 8.507059e+37 }
 0x194   : > { %v1386_v19 = vpop.eup %1385 }
 0x195   : > { %v1199_v45 = vmul.f32 %v1386_v19, %v1137_v53  ;;  %vm1204_vm11 = vweird.f32 %v1386_v19 }
 0x196   : > { %vm1205_vm14 = vmor %vm1203_vm12, %vm1204_vm11 }
 0x197   : > { %v1200_v55 = vsub.f32 1.0, %v1199_v45 }
 0x199   : > { %v1201_v63 = vmul.f32 %v1386_v19, %v1200_v55 }
 0x19b   : > { %v1202_v62 = vadd.f32 %v1386_v19, %v1201_v63 }
 0x19d   : > { %v1206_v59 = vsel %vm1205_vm14, %v1386_v19, %v1202_v62 }
 0x19e   : > { %v1211_v5 = vsel %vm1208_vm15, %v1210_v9, %v1206_v59 }
 0x19f   : > { %1218 = vst.msk [vmem:[%s2133_s2 + $0x20] sm:$0xff] %vm1213_vm13, %v1211_v5 }
 0x1a0 PF: > { %s14_s14 = sadd.s32 1, %s1394_s14  }
 0x1a1   : > { %p11_p4 = scmp.ge.s32.totalorder %s14_s14, 4  }
 0x1a3   :  { %13 = sbr.rel (!%p11_p4) target bundleno = 2 (0x2), region = 64 }

</bundles_post_ra>
